<compile_context>
chip_gen: v7x
topology: tpu7x:2x2x1
jax: 0.10.0
libtpu: 0.0.40
codegen_flags: <defaults>
</compile_context>

<pallas_src>
import functools

import jax
import jax.numpy as jnp
from jax import lax
from jax.experimental import pallas as pl
from jax.experimental.pallas import tpu as pltpu

_ALPHA = 100000.0        # self.alpha_ in the PyTorch module
_MAX_BLOCK_BATCH = 16    # problems per grid step (keeps per-step VMEM tiny)


def _logsumexp(x, axis):
    m = jnp.max(x, axis=axis, keepdims=True)
    return jnp.log(jnp.sum(jnp.exp(x - m), axis=axis, keepdims=True)) + m


def _sot_kernel(x_ref, w_ref, *, lambda_: float, n_iter: int):
    # x_ref block: (bt, N, D) in the caller's native dtype; cast once in-kernel
    # (free on the VPU) so sub-f32 inputs don't double the HBM->VMEM DMA bytes.
    x = x_ref[...].astype(jnp.float32)
    bt, n, _ = x.shape

    # V = x / ||x||_2 per row.  rsqrt runs on the otherwise-idle EUP slot,
    # turning the normalize into one EUP op + one VPU multiply (no divide).
    inv_norm = lax.rsqrt(jnp.sum(x * x, axis=2, keepdims=True))
    v_feat = x * inv_norm                                     # (bt, N, D)

    # S = V @ V.T per problem: batched MXU contraction over the feature axis
    # (no XLU transpose of v_feat materialized).  HIGHEST precision keeps S in
    # full f32 — the Sinkhorn exponent amplifies any bf16-pass rounding by
    # 2*lambda_, and the contraction (K = D) is tiny anyway.
    s = lax.dot_general(
        v_feat, v_feat,
        dimension_numbers=(((2,), (2,)), ((0,), (0,))),
        precision=lax.Precision.HIGHEST,
        preferred_element_type=jnp.float32)                   # (bt, N, N)

    row = lax.broadcasted_iota(jnp.int32, (bt, n, n), 1)
    col = lax.broadcasted_iota(jnp.int32, (bt, n, n), 2)
    diag = row == col

    # Cost D = 2*(1 - S) with diag(D) = alpha, folded directly into the
    # Sinkhorn log-kernel Mr = -D * lambda_  (POT sinkhorn_log, reg = 1/lambda).
    mr = jnp.where(diag, -_ALPHA * lambda_, -2.0 * lambda_ * (1.0 - s))

    # ot.bregman.sinkhorn_log with a = b = ones(N)  (log a = log b = 0):
    #   v <- -logsumexp(Mr + u, axis=rows);  u <- -logsumexp(Mr + v, axis=cols)
    # fori_loop bounds the carry live-ranges; unroll=True keeps full LLO
    # scheduler visibility for the short fixed trip count.
    # TODO(synk): POT checks a convergence criterion every 10 iterations and
    # may break early; we always run the fixed numItermax iterations instead.
    def body(_, carry):
        u, vv = carry
        vv = -_logsumexp(mr + u, axis=1)    # (bt, 1, N)
        u = -_logsumexp(mr + vv, axis=2)    # (bt, N, 1)
        return u, vv

    u, vv = lax.fori_loop(
        0, n_iter, body,
        (jnp.zeros((bt, n, 1), jnp.float32), jnp.zeros((bt, 1, n), jnp.float32)),
        unroll=True)

    # W = exp(Mr + u + v);  W.fill_diagonal_(1) == exp(0), so mask the exponent
    # on the diagonal before the exp instead of patching afterwards.
    w_ref[...] = jnp.exp(jnp.where(diag, 0.0, mr + u + vv))


def sot_forward_batched(x, *, lambda_: float, n_iter: int, feed_forward: bool,
                        block_batch: int | None = None):
    """Batched SOT: x is [B, N, D] -> [B, N, N+D] (or [B, N, N])."""
    b, n, d = x.shape

    if block_batch is None:
        # >= 2 grid steps when B >= 2 so both v7x TensorCores get work; cap the
        # per-step problem count to keep the VMEM working set small.
        steps = 1 if b == 1 else max(2, pl.cdiv(b, _MAX_BLOCK_BATCH))
        block_batch = pl.cdiv(b, steps)
    bt = max(1, min(block_batch, b))
    steps = pl.cdiv(b, bt)
    b_pad = steps * bt

    x_in = x
    if b_pad != b:
        # Pad the batch with a benign problem (all-ones rows -> finite norms);
        # padded outputs are dropped below and never touch real problems.
        x_in = jnp.concatenate([x, jnp.ones((b_pad - b, n, d), x.dtype)], axis=0)

    kernel = functools.partial(_sot_kernel, lambda_=lambda_, n_iter=n_iter)
    w = pl.pallas_call(
        kernel,
        out_shape=jax.ShapeDtypeStruct((b_pad, n, n), jnp.float32),
        grid=(steps,),
        in_specs=[pl.BlockSpec((bt, n, d), lambda i: (i, 0, 0))],
        out_specs=pl.BlockSpec((bt, n, n), lambda i: (i, 0, 0)),
        compiler_params=pltpu.CompilerParams(
            # Problems are independent -> megacore splits the grid.
            # NOTE: for much larger N, also set vmem_limit_bytes and tile the
            # Sinkhorn logsumexp (v7x has 64 MiB VMEM, v5e 16 MiB scoped).
            dimension_semantics=("parallel",)),
    )(x_in)  # pass x in its native dtype; the kernel casts once internally

    if b_pad != b:
        w = w[:b]
    if feed_forward:
        # Exact torch.cat((W, x), dim=1); tiny copy, strictly less HBM traffic
        # than emitting a lane-padded slab from the kernel and slicing it.
        return jnp.concatenate([w, x.astype(jnp.float32)], axis=-1)
    return w


def sot_forward(x, *, lambda_: float, n_iter: int, feed_forward: bool):
    """Single problem [N, D], matching the PyTorch module's forward."""
    return sot_forward_batched(x[None], lambda_=lambda_, n_iter=n_iter,
                               feed_forward=feed_forward)[0]


def _sot_reference(x, *, lambda_: float, n_iter: int, feed_forward: bool):
    """Pure-JAX reference mirroring the PyTorch forward (POT sinkhorn_log)."""
    x = x.astype(jnp.float32)
    v = x / jnp.linalg.norm(x, axis=1, keepdims=True)
    s = jnp.dot(v, v.T, precision=lax.Precision.HIGHEST)
    n = s.shape[0]
    dmat = 2.0 * (1.0 - s)
    dmat = dmat.at[jnp.arange(n), jnp.arange(n)].set(_ALPHA)
    mr = -dmat * lambda_
    u = jnp.zeros((n, 1), jnp.float32)
    vv = jnp.zeros((1, n), jnp.float32)
    for _ in range(n_iter):
        vv = -jax.nn.logsumexp(mr + u, axis=0, keepdims=True)
        u = -jax.nn.logsumexp(mr + vv, axis=1, keepdims=True)
    w = jnp.exp(mr + u + vv)
    w = w.at[jnp.arange(n), jnp.arange(n)].set(1.0)
    if feed_forward:
        return jnp.concatenate([w, x], axis=1)
    return w


if __name__ == "__main__":
    # Module hyper-parameters (no learned weights in this module).
    final_feat_dim = 32
    lambda_ = 25.0
    n_iter = 10
    feed_forward = True

    n_samples = 8
    batch = 4
    key = jax.random.PRNGKey(0)
    xb = jax.random.normal(key, (batch, n_samples, final_feat_dim),
                           dtype=jnp.float32)

    # Tolerance: rsqrt-vs-(sqrt+div) and exp/log ulp differences vs the
    # pure-XLA reference, amplified ~2*lambda by the OT exponent.
    rtol = atol = 5e-4

    # Batched call (the intended high-throughput path).
    out_b = jax.block_until_ready(
        sot_forward_batched(xb, lambda_=lambda_, n_iter=n_iter,
                            feed_forward=feed_forward))
    ref_b = jax.vmap(functools.partial(_sot_reference, lambda_=lambda_,
                                       n_iter=n_iter,
                                       feed_forward=feed_forward))(xb)
    assert out_b.shape == (batch, n_samples, n_samples + final_feat_dim), out_b.shape
    assert jnp.allclose(out_b, ref_b, rtol=rtol, atol=atol), "batched mismatch"

    # Single-problem call, matching the PyTorch module semantics.
    out1 = jax.block_until_ready(
        sot_forward(xb[0], lambda_=lambda_, n_iter=n_iter,
                    feed_forward=feed_forward))
    ref1 = _sot_reference(xb[0], lambda_=lambda_, n_iter=n_iter,
                          feed_forward=feed_forward)
    assert out1.shape == (n_samples, n_samples + final_feat_dim), out1.shape
    assert jnp.allclose(out1, ref1, rtol=rtol, atol=atol), "single mismatch"

    # feed_forward=False path (returns W only).
    out_w = jax.block_until_ready(
        sot_forward(xb[0], lambda_=lambda_, n_iter=n_iter, feed_forward=False))
    ref_w = _sot_reference(xb[0], lambda_=lambda_, n_iter=n_iter,
                           feed_forward=False)
    assert out_w.shape == (n_samples, n_samples), out_w.shape
    assert jnp.allclose(out_w, ref_w, rtol=rtol, atol=atol), "W-only mismatch"

    print("KERNEL_OK")
</pallas_src>

<mosaic_0001>
module attributes {stable_mosaic.version = 11 : i64} {
  func.func @_sot_kernel(%arg0: i32, %arg1: memref<2x8x32xf32, #tpu.memory_space<vmem>>, %arg2: memref<2x8x8xf32, #tpu.memory_space<vmem>>) attributes {dimension_semantics = [#tpu.dimension_semantics<parallel>], iteration_bounds = array<i64: 2>, scalar_prefetch = 0 : i64, scratch_operands = 0 : i64, tpu.core_type = #tpu.core_type<tc>, window_params = [{transform_indices = @transform_0, window_bounds = array<i64: 2, 8, 32>}, {transform_indices = @transform_1, window_bounds = array<i64: 2, 8, 8>}]} {
    %c0 = arith.constant 0 : index
    %c0_0 = arith.constant 0 : index
    %c0_1 = arith.constant 0 : index
    %0 = vector.load %arg1[%c0, %c0_0, %c0_1] : memref<2x8x32xf32, #tpu.memory_space<vmem>>, vector<2x8x32xf32>
    %1 = arith.mulf %0, %0 : vector<2x8x32xf32>
    %cst = arith.constant dense<0.000000e+00> : vector<2x8xf32>
    %2 = vector.multi_reduction <add>, %1, %cst [2] : vector<2x8x32xf32> to vector<2x8xf32>
    %3 = vector.shape_cast %2 : vector<2x8xf32> to vector<2x8x1xf32>
    %4 = math.rsqrt %3 : vector<2x8x1xf32>
    %5 = vector.broadcast %4 : vector<2x8x1xf32> to vector<2x8x32xf32>
    %6 = arith.mulf %0, %5 : vector<2x8x32xf32>
    %cst_2 = arith.constant dense<0.000000e+00> : vector<2x8x8xf32>
    %7 = tpu.matmul %6, %6, %cst_2 {dimension_numbers = #tpu.dot_dimension_numbers<[2], [2], [1], [1], [0, 0, 0, 1, 1, 1], [0], [0]>, precision = #tpu.contract_precision<fp32>} : vector<2x8x32xf32>, vector<2x8x32xf32>, vector<2x8x8xf32> -> vector<2x8x8xf32>
    %8 = tpu.iota {dimensions = array<i32: 1>} : vector<2x8x8xi32>
    %9 = tpu.iota {dimensions = array<i32: 2>} : vector<2x8x8xi32>
    %10 = arith.cmpi eq, %8, %9 : vector<2x8x8xi32>
    %cst_3 = arith.constant 1.000000e+00 : f32
    %11 = vector.broadcast %cst_3 : f32 to vector<2x8x8xf32>
    %12 = arith.subf %11, %7 : vector<2x8x8xf32>
    %cst_4 = arith.constant -5.000000e+01 : f32
    %13 = vector.broadcast %cst_4 : f32 to vector<2x8x8xf32>
    %14 = arith.mulf %13, %12 : vector<2x8x8xf32>
    %cst_5 = arith.constant -2.500000e+06 : f32
    %15 = vector.broadcast %cst_5 : f32 to vector<2x8x8xf32>
    %16 = arith.select %10, %15, %14 : vector<2x8x8xi1>, vector<2x8x8xf32>
    %cst_6 = arith.constant 0.000000e+00 : f32
    %17 = vector.broadcast %cst_6 : f32 to vector<2x8x1xf32>
    %cst_7 = arith.constant 0.000000e+00 : f32
    %18 = vector.broadcast %cst_7 : f32 to vector<2x1x8xf32>
    %c0_i32 = arith.constant 0 : i32
    %19 = vector.broadcast %17 : vector<2x8x1xf32> to vector<2x8x8xf32>
    %20 = arith.addf %16, %19 : vector<2x8x8xf32>
    %cst_8 = arith.constant dense<0xFF800000> : vector<2x8xf32>
    %21 = vector.multi_reduction <maximumf>, %20, %cst_8 [1] : vector<2x8x8xf32> to vector<2x8xf32>
    %22 = vector.shape_cast %21 : vector<2x8xf32> to vector<2x1x8xf32>
    %23 = vector.broadcast %22 : vector<2x1x8xf32> to vector<2x8x8xf32>
    %24 = arith.subf %20, %23 : vector<2x8x8xf32>
    %25 = math.exp %24 : vector<2x8x8xf32>
    %cst_9 = arith.constant dense<0.000000e+00> : vector<2x8xf32>
    %26 = vector.multi_reduction <add>, %25, %cst_9 [1] : vector<2x8x8xf32> to vector<2x8xf32>
    %27 = vector.shape_cast %26 : vector<2x8xf32> to vector<2x1x8xf32>
    %28 = math.log %27 : vector<2x1x8xf32>
    %29 = arith.addf %28, %22 : vector<2x1x8xf32>
    %cst_10 = arith.constant 0.000000e+00 : f32
    %30 = vector.broadcast %cst_10 : f32 to vector<2x1x8xf32>
    %31 = arith.subf %30, %29 : vector<2x1x8xf32>
    %32 = vector.broadcast %31 : vector<2x1x8xf32> to vector<2x8x8xf32>
    %33 = arith.addf %16, %32 : vector<2x8x8xf32>
    %cst_11 = arith.constant dense<0xFF800000> : vector<2x8xf32>
    %34 = vector.multi_reduction <maximumf>, %33, %cst_11 [2] : vector<2x8x8xf32> to vector<2x8xf32>
    %35 = vector.shape_cast %34 : vector<2x8xf32> to vector<2x8x1xf32>
    %36 = vector.broadcast %35 : vector<2x8x1xf32> to vector<2x8x8xf32>
    %37 = arith.subf %33, %36 : vector<2x8x8xf32>
    %38 = math.exp %37 : vector<2x8x8xf32>
    %cst_12 = arith.constant dense<0.000000e+00> : vector<2x8xf32>
    %39 = vector.multi_reduction <add>, %38, %cst_12 [2] : vector<2x8x8xf32> to vector<2x8xf32>
    %40 = vector.shape_cast %39 : vector<2x8xf32> to vector<2x8x1xf32>
    %41 = math.log %40 : vector<2x8x1xf32>
    %42 = arith.addf %41, %35 : vector<2x8x1xf32>
    %cst_13 = arith.constant 0.000000e+00 : f32
    %43 = vector.broadcast %cst_13 : f32 to vector<2x8x1xf32>
    %44 = arith.subf %43, %42 : vector<2x8x1xf32>
    %c1_i32 = arith.constant 1 : i32
    %45 = vector.broadcast %44 : vector<2x8x1xf32> to vector<2x8x8xf32>
    %46 = arith.addf %16, %45 : vector<2x8x8xf32>
    %cst_14 = arith.constant dense<0xFF800000> : vector<2x8xf32>
    %47 = vector.multi_reduction <maximumf>, %46, %cst_14 [1] : vector<2x8x8xf32> to vector<2x8xf32>
    %48 = vector.shape_cast %47 : vector<2x8xf32> to vector<2x1x8xf32>
    %49 = vector.broadcast %48 : vector<2x1x8xf32> to vector<2x8x8xf32>
    %50 = arith.subf %46, %49 : vector<2x8x8xf32>
    %51 = math.exp %50 : vector<2x8x8xf32>
    %cst_15 = arith.constant dense<0.000000e+00> : vector<2x8xf32>
    %52 = vector.multi_reduction <add>, %51, %cst_15 [1] : vector<2x8x8xf32> to vector<2x8xf32>
    %53 = vector.shape_cast %52 : vector<2x8xf32> to vector<2x1x8xf32>
    %54 = math.log %53 : vector<2x1x8xf32>
    %55 = arith.addf %54, %48 : vector<2x1x8xf32>
    %cst_16 = arith.constant 0.000000e+00 : f32
    %56 = vector.broadcast %cst_16 : f32 to vector<2x1x8xf32>
    %57 = arith.subf %56, %55 : vector<2x1x8xf32>
    %58 = vector.broadcast %57 : vector<2x1x8xf32> to vector<2x8x8xf32>
    %59 = arith.addf %16, %58 : vector<2x8x8xf32>
    %cst_17 = arith.constant dense<0xFF800000> : vector<2x8xf32>
    %60 = vector.multi_reduction <maximumf>, %59, %cst_17 [2] : vector<2x8x8xf32> to vector<2x8xf32>
    %61 = vector.shape_cast %60 : vector<2x8xf32> to vector<2x8x1xf32>
    %62 = vector.broadcast %61 : vector<2x8x1xf32> to vector<2x8x8xf32>
    %63 = arith.subf %59, %62 : vector<2x8x8xf32>
    %64 = math.exp %63 : vector<2x8x8xf32>
    %cst_18 = arith.constant dense<0.000000e+00> : vector<2x8xf32>
    %65 = vector.multi_reduction <add>, %64, %cst_18 [2] : vector<2x8x8xf32> to vector<2x8xf32>
    %66 = vector.shape_cast %65 : vector<2x8xf32> to vector<2x8x1xf32>
    %67 = math.log %66 : vector<2x8x1xf32>
    %68 = arith.addf %67, %61 : vector<2x8x1xf32>
    %cst_19 = arith.constant 0.000000e+00 : f32
    %69 = vector.broadcast %cst_19 : f32 to vector<2x8x1xf32>
    %70 = arith.subf %69, %68 : vector<2x8x1xf32>
    %c2_i32 = arith.constant 2 : i32
    %71 = vector.broadcast %70 : vector<2x8x1xf32> to vector<2x8x8xf32>
    %72 = arith.addf %16, %71 : vector<2x8x8xf32>
    %cst_20 = arith.constant dense<0xFF800000> : vector<2x8xf32>
    %73 = vector.multi_reduction <maximumf>, %72, %cst_20 [1] : vector<2x8x8xf32> to vector<2x8xf32>
    %74 = vector.shape_cast %73 : vector<2x8xf32> to vector<2x1x8xf32>
    %75 = vector.broadcast %74 : vector<2x1x8xf32> to vector<2x8x8xf32>
    %76 = arith.subf %72, %75 : vector<2x8x8xf32>
    %77 = math.exp %76 : vector<2x8x8xf32>
    %cst_21 = arith.constant dense<0.000000e+00> : vector<2x8xf32>
    %78 = vector.multi_reduction <add>, %77, %cst_21 [1] : vector<2x8x8xf32> to vector<2x8xf32>
    %79 = vector.shape_cast %78 : vector<2x8xf32> to vector<2x1x8xf32>
    %80 = math.log %79 : vector<2x1x8xf32>
    %81 = arith.addf %80, %74 : vector<2x1x8xf32>
    %cst_22 = arith.constant 0.000000e+00 : f32
    %82 = vector.broadcast %cst_22 : f32 to vector<2x1x8xf32>
    %83 = arith.subf %82, %81 : vector<2x1x8xf32>
    %84 = vector.broadcast %83 : vector<2x1x8xf32> to vector<2x8x8xf32>
    %85 = arith.addf %16, %84 : vector<2x8x8xf32>
    %cst_23 = arith.constant dense<0xFF800000> : vector<2x8xf32>
    %86 = vector.multi_reduction <maximumf>, %85, %cst_23 [2] : vector<2x8x8xf32> to vector<2x8xf32>
    %87 = vector.shape_cast %86 : vector<2x8xf32> to vector<2x8x1xf32>
    %88 = vector.broadcast %87 : vector<2x8x1xf32> to vector<2x8x8xf32>
    %89 = arith.subf %85, %88 : vector<2x8x8xf32>
    %90 = math.exp %89 : vector<2x8x8xf32>
    %cst_24 = arith.constant dense<0.000000e+00> : vector<2x8xf32>
    %91 = vector.multi_reduction <add>, %90, %cst_24 [2] : vector<2x8x8xf32> to vector<2x8xf32>
    %92 = vector.shape_cast %91 : vector<2x8xf32> to vector<2x8x1xf32>
    %93 = math.log %92 : vector<2x8x1xf32>
    %94 = arith.addf %93, %87 : vector<2x8x1xf32>
    %cst_25 = arith.constant 0.000000e+00 : f32
    %95 = vector.broadcast %cst_25 : f32 to vector<2x8x1xf32>
    %96 = arith.subf %95, %94 : vector<2x8x1xf32>
    %c3_i32 = arith.constant 3 : i32
    %97 = vector.broadcast %96 : vector<2x8x1xf32> to vector<2x8x8xf32>
    %98 = arith.addf %16, %97 : vector<2x8x8xf32>
    %cst_26 = arith.constant dense<0xFF800000> : vector<2x8xf32>
    %99 = vector.multi_reduction <maximumf>, %98, %cst_26 [1] : vector<2x8x8xf32> to vector<2x8xf32>
    %100 = vector.shape_cast %99 : vector<2x8xf32> to vector<2x1x8xf32>
    %101 = vector.broadcast %100 : vector<2x1x8xf32> to vector<2x8x8xf32>
    %102 = arith.subf %98, %101 : vector<2x8x8xf32>
    %103 = math.exp %102 : vector<2x8x8xf32>
    %cst_27 = arith.constant dense<0.000000e+00> : vector<2x8xf32>
    %104 = vector.multi_reduction <add>, %103, %cst_27 [1] : vector<2x8x8xf32> to vector<2x8xf32>
    %105 = vector.shape_cast %104 : vector<2x8xf32> to vector<2x1x8xf32>
    %106 = math.log %105 : vector<2x1x8xf32>
    %107 = arith.addf %106, %100 : vector<2x1x8xf32>
    %cst_28 = arith.constant 0.000000e+00 : f32
    %108 = vector.broadcast %cst_28 : f32 to vector<2x1x8xf32>
    %109 = arith.subf %108, %107 : vector<2x1x8xf32>
    %110 = vector.broadcast %109 : vector<2x1x8xf32> to vector<2x8x8xf32>
    %111 = arith.addf %16, %110 : vector<2x8x8xf32>
    %cst_29 = arith.constant dense<0xFF800000> : vector<2x8xf32>
    %112 = vector.multi_reduction <maximumf>, %111, %cst_29 [2] : vector<2x8x8xf32> to vector<2x8xf32>
    %113 = vector.shape_cast %112 : vector<2x8xf32> to vector<2x8x1xf32>
    %114 = vector.broadcast %113 : vector<2x8x1xf32> to vector<2x8x8xf32>
    %115 = arith.subf %111, %114 : vector<2x8x8xf32>
    %116 = math.exp %115 : vector<2x8x8xf32>
    %cst_30 = arith.constant dense<0.000000e+00> : vector<2x8xf32>
    %117 = vector.multi_reduction <add>, %116, %cst_30 [2] : vector<2x8x8xf32> to vector<2x8xf32>
    %118 = vector.shape_cast %117 : vector<2x8xf32> to vector<2x8x1xf32>
    %119 = math.log %118 : vector<2x8x1xf32>
    %120 = arith.addf %119, %113 : vector<2x8x1xf32>
    %cst_31 = arith.constant 0.000000e+00 : f32
    %121 = vector.broadcast %cst_31 : f32 to vector<2x8x1xf32>
    %122 = arith.subf %121, %120 : vector<2x8x1xf32>
    %c4_i32 = arith.constant 4 : i32
    %123 = vector.broadcast %122 : vector<2x8x1xf32> to vector<2x8x8xf32>
    %124 = arith.addf %16, %123 : vector<2x8x8xf32>
    %cst_32 = arith.constant dense<0xFF800000> : vector<2x8xf32>
    %125 = vector.multi_reduction <maximumf>, %124, %cst_32 [1] : vector<2x8x8xf32> to vector<2x8xf32>
    %126 = vector.shape_cast %125 : vector<2x8xf32> to vector<2x1x8xf32>
    %127 = vector.broadcast %126 : vector<2x1x8xf32> to vector<2x8x8xf32>
    %128 = arith.subf %124, %127 : vector<2x8x8xf32>
    %129 = math.exp %128 : vector<2x8x8xf32>
    %cst_33 = arith.constant dense<0.000000e+00> : vector<2x8xf32>
    %130 = vector.multi_reduction <add>, %129, %cst_33 [1] : vector<2x8x8xf32> to vector<2x8xf32>
    %131 = vector.shape_cast %130 : vector<2x8xf32> to vector<2x1x8xf32>
    %132 = math.log %131 : vector<2x1x8xf32>
    %133 = arith.addf %132, %126 : vector<2x1x8xf32>
    %cst_34 = arith.constant 0.000000e+00 : f32
    %134 = vector.broadcast %cst_34 : f32 to vector<2x1x8xf32>
    %135 = arith.subf %134, %133 : vector<2x1x8xf32>
    %136 = vector.broadcast %135 : vector<2x1x8xf32> to vector<2x8x8xf32>
    %137 = arith.addf %16, %136 : vector<2x8x8xf32>
    %cst_35 = arith.constant dense<0xFF800000> : vector<2x8xf32>
    %138 = vector.multi_reduction <maximumf>, %137, %cst_35 [2] : vector<2x8x8xf32> to vector<2x8xf32>
    %139 = vector.shape_cast %138 : vector<2x8xf32> to vector<2x8x1xf32>
    %140 = vector.broadcast %139 : vector<2x8x1xf32> to vector<2x8x8xf32>
    %141 = arith.subf %137, %140 : vector<2x8x8xf32>
    %142 = math.exp %141 : vector<2x8x8xf32>
    %cst_36 = arith.constant dense<0.000000e+00> : vector<2x8xf32>
    %143 = vector.multi_reduction <add>, %142, %cst_36 [2] : vector<2x8x8xf32> to vector<2x8xf32>
    %144 = vector.shape_cast %143 : vector<2x8xf32> to vector<2x8x1xf32>
    %145 = math.log %144 : vector<2x8x1xf32>
    %146 = arith.addf %145, %139 : vector<2x8x1xf32>
    %cst_37 = arith.constant 0.000000e+00 : f32
    %147 = vector.broadcast %cst_37 : f32 to vector<2x8x1xf32>
    %148 = arith.subf %147, %146 : vector<2x8x1xf32>
    %c5_i32 = arith.constant 5 : i32
    %149 = vector.broadcast %148 : vector<2x8x1xf32> to vector<2x8x8xf32>
    %150 = arith.addf %16, %149 : vector<2x8x8xf32>
    %cst_38 = arith.constant dense<0xFF800000> : vector<2x8xf32>
    %151 = vector.multi_reduction <maximumf>, %150, %cst_38 [1] : vector<2x8x8xf32> to vector<2x8xf32>
    %152 = vector.shape_cast %151 : vector<2x8xf32> to vector<2x1x8xf32>
    %153 = vector.broadcast %152 : vector<2x1x8xf32> to vector<2x8x8xf32>
    %154 = arith.subf %150, %153 : vector<2x8x8xf32>
    %155 = math.exp %154 : vector<2x8x8xf32>
    %cst_39 = arith.constant dense<0.000000e+00> : vector<2x8xf32>
    %156 = vector.multi_reduction <add>, %155, %cst_39 [1] : vector<2x8x8xf32> to vector<2x8xf32>
    %157 = vector.shape_cast %156 : vector<2x8xf32> to vector<2x1x8xf32>
    %158 = math.log %157 : vector<2x1x8xf32>
    %159 = arith.addf %158, %152 : vector<2x1x8xf32>
    %cst_40 = arith.constant 0.000000e+00 : f32
    %160 = vector.broadcast %cst_40 : f32 to vector<2x1x8xf32>
    %161 = arith.subf %160, %159 : vector<2x1x8xf32>
    %162 = vector.broadcast %161 : vector<2x1x8xf32> to vector<2x8x8xf32>
    %163 = arith.addf %16, %162 : vector<2x8x8xf32>
    %cst_41 = arith.constant dense<0xFF800000> : vector<2x8xf32>
    %164 = vector.multi_reduction <maximumf>, %163, %cst_41 [2] : vector<2x8x8xf32> to vector<2x8xf32>
    %165 = vector.shape_cast %164 : vector<2x8xf32> to vector<2x8x1xf32>
    %166 = vector.broadcast %165 : vector<2x8x1xf32> to vector<2x8x8xf32>
    %167 = arith.subf %163, %166 : vector<2x8x8xf32>
    %168 = math.exp %167 : vector<2x8x8xf32>
    %cst_42 = arith.constant dense<0.000000e+00> : vector<2x8xf32>
    %169 = vector.multi_reduction <add>, %168, %cst_42 [2] : vector<2x8x8xf32> to vector<2x8xf32>
    %170 = vector.shape_cast %169 : vector<2x8xf32> to vector<2x8x1xf32>
    %171 = math.log %170 : vector<2x8x1xf32>
    %172 = arith.addf %171, %165 : vector<2x8x1xf32>
    %cst_43 = arith.constant 0.000000e+00 : f32
    %173 = vector.broadcast %cst_43 : f32 to vector<2x8x1xf32>
    %174 = arith.subf %173, %172 : vector<2x8x1xf32>
    %c6_i32 = arith.constant 6 : i32
    %175 = vector.broadcast %174 : vector<2x8x1xf32> to vector<2x8x8xf32>
    %176 = arith.addf %16, %175 : vector<2x8x8xf32>
    %cst_44 = arith.constant dense<0xFF800000> : vector<2x8xf32>
    %177 = vector.multi_reduction <maximumf>, %176, %cst_44 [1] : vector<2x8x8xf32> to vector<2x8xf32>
    %178 = vector.shape_cast %177 : vector<2x8xf32> to vector<2x1x8xf32>
    %179 = vector.broadcast %178 : vector<2x1x8xf32> to vector<2x8x8xf32>
    %180 = arith.subf %176, %179 : vector<2x8x8xf32>
    %181 = math.exp %180 : vector<2x8x8xf32>
    %cst_45 = arith.constant dense<0.000000e+00> : vector<2x8xf32>
    %182 = vector.multi_reduction <add>, %181, %cst_45 [1] : vector<2x8x8xf32> to vector<2x8xf32>
    %183 = vector.shape_cast %182 : vector<2x8xf32> to vector<2x1x8xf32>
    %184 = math.log %183 : vector<2x1x8xf32>
    %185 = arith.addf %184, %178 : vector<2x1x8xf32>
    %cst_46 = arith.constant 0.000000e+00 : f32
    %186 = vector.broadcast %cst_46 : f32 to vector<2x1x8xf32>
    %187 = arith.subf %186, %185 : vector<2x1x8xf32>
    %188 = vector.broadcast %187 : vector<2x1x8xf32> to vector<2x8x8xf32>
    %189 = arith.addf %16, %188 : vector<2x8x8xf32>
    %cst_47 = arith.constant dense<0xFF800000> : vector<2x8xf32>
    %190 = vector.multi_reduction <maximumf>, %189, %cst_47 [2] : vector<2x8x8xf32> to vector<2x8xf32>
    %191 = vector.shape_cast %190 : vector<2x8xf32> to vector<2x8x1xf32>
    %192 = vector.broadcast %191 : vector<2x8x1xf32> to vector<2x8x8xf32>
    %193 = arith.subf %189, %192 : vector<2x8x8xf32>
    %194 = math.exp %193 : vector<2x8x8xf32>
    %cst_48 = arith.constant dense<0.000000e+00> : vector<2x8xf32>
    %195 = vector.multi_reduction <add>, %194, %cst_48 [2] : vector<2x8x8xf32> to vector<2x8xf32>
    %196 = vector.shape_cast %195 : vector<2x8xf32> to vector<2x8x1xf32>
    %197 = math.log %196 : vector<2x8x1xf32>
    %198 = arith.addf %197, %191 : vector<2x8x1xf32>
    %cst_49 = arith.constant 0.000000e+00 : f32
    %199 = vector.broadcast %cst_49 : f32 to vector<2x8x1xf32>
    %200 = arith.subf %199, %198 : vector<2x8x1xf32>
    %c7_i32 = arith.constant 7 : i32
    %201 = vector.broadcast %200 : vector<2x8x1xf32> to vector<2x8x8xf32>
    %202 = arith.addf %16, %201 : vector<2x8x8xf32>
    %cst_50 = arith.constant dense<0xFF800000> : vector<2x8xf32>
    %203 = vector.multi_reduction <maximumf>, %202, %cst_50 [1] : vector<2x8x8xf32> to vector<2x8xf32>
    %204 = vector.shape_cast %203 : vector<2x8xf32> to vector<2x1x8xf32>
    %205 = vector.broadcast %204 : vector<2x1x8xf32> to vector<2x8x8xf32>
    %206 = arith.subf %202, %205 : vector<2x8x8xf32>
    %207 = math.exp %206 : vector<2x8x8xf32>
    %cst_51 = arith.constant dense<0.000000e+00> : vector<2x8xf32>
    %208 = vector.multi_reduction <add>, %207, %cst_51 [1] : vector<2x8x8xf32> to vector<2x8xf32>
    %209 = vector.shape_cast %208 : vector<2x8xf32> to vector<2x1x8xf32>
    %210 = math.log %209 : vector<2x1x8xf32>
    %211 = arith.addf %210, %204 : vector<2x1x8xf32>
    %cst_52 = arith.constant 0.000000e+00 : f32
    %212 = vector.broadcast %cst_52 : f32 to vector<2x1x8xf32>
    %213 = arith.subf %212, %211 : vector<2x1x8xf32>
    %214 = vector.broadcast %213 : vector<2x1x8xf32> to vector<2x8x8xf32>
    %215 = arith.addf %16, %214 : vector<2x8x8xf32>
    %cst_53 = arith.constant dense<0xFF800000> : vector<2x8xf32>
    %216 = vector.multi_reduction <maximumf>, %215, %cst_53 [2] : vector<2x8x8xf32> to vector<2x8xf32>
    %217 = vector.shape_cast %216 : vector<2x8xf32> to vector<2x8x1xf32>
    %218 = vector.broadcast %217 : vector<2x8x1xf32> to vector<2x8x8xf32>
    %219 = arith.subf %215, %218 : vector<2x8x8xf32>
    %220 = math.exp %219 : vector<2x8x8xf32>
    %cst_54 = arith.constant dense<0.000000e+00> : vector<2x8xf32>
    %221 = vector.multi_reduction <add>, %220, %cst_54 [2] : vector<2x8x8xf32> to vector<2x8xf32>
    %222 = vector.shape_cast %221 : vector<2x8xf32> to vector<2x8x1xf32>
    %223 = math.log %222 : vector<2x8x1xf32>
    %224 = arith.addf %223, %217 : vector<2x8x1xf32>
    %cst_55 = arith.constant 0.000000e+00 : f32
    %225 = vector.broadcast %cst_55 : f32 to vector<2x8x1xf32>
    %226 = arith.subf %225, %224 : vector<2x8x1xf32>
    %c8_i32 = arith.constant 8 : i32
    %227 = vector.broadcast %226 : vector<2x8x1xf32> to vector<2x8x8xf32>
    %228 = arith.addf %16, %227 : vector<2x8x8xf32>
    %cst_56 = arith.constant dense<0xFF800000> : vector<2x8xf32>
    %229 = vector.multi_reduction <maximumf>, %228, %cst_56 [1] : vector<2x8x8xf32> to vector<2x8xf32>
    %230 = vector.shape_cast %229 : vector<2x8xf32> to vector<2x1x8xf32>
    %231 = vector.broadcast %230 : vector<2x1x8xf32> to vector<2x8x8xf32>
    %232 = arith.subf %228, %231 : vector<2x8x8xf32>
    %233 = math.exp %232 : vector<2x8x8xf32>
    %cst_57 = arith.constant dense<0.000000e+00> : vector<2x8xf32>
    %234 = vector.multi_reduction <add>, %233, %cst_57 [1] : vector<2x8x8xf32> to vector<2x8xf32>
    %235 = vector.shape_cast %234 : vector<2x8xf32> to vector<2x1x8xf32>
    %236 = math.log %235 : vector<2x1x8xf32>
    %237 = arith.addf %236, %230 : vector<2x1x8xf32>
    %cst_58 = arith.constant 0.000000e+00 : f32
    %238 = vector.broadcast %cst_58 : f32 to vector<2x1x8xf32>
    %239 = arith.subf %238, %237 : vector<2x1x8xf32>
    %240 = vector.broadcast %239 : vector<2x1x8xf32> to vector<2x8x8xf32>
    %241 = arith.addf %16, %240 : vector<2x8x8xf32>
    %cst_59 = arith.constant dense<0xFF800000> : vector<2x8xf32>
    %242 = vector.multi_reduction <maximumf>, %241, %cst_59 [2] : vector<2x8x8xf32> to vector<2x8xf32>
    %243 = vector.shape_cast %242 : vector<2x8xf32> to vector<2x8x1xf32>
    %244 = vector.broadcast %243 : vector<2x8x1xf32> to vector<2x8x8xf32>
    %245 = arith.subf %241, %244 : vector<2x8x8xf32>
    %246 = math.exp %245 : vector<2x8x8xf32>
    %cst_60 = arith.constant dense<0.000000e+00> : vector<2x8xf32>
    %247 = vector.multi_reduction <add>, %246, %cst_60 [2] : vector<2x8x8xf32> to vector<2x8xf32>
    %248 = vector.shape_cast %247 : vector<2x8xf32> to vector<2x8x1xf32>
    %249 = math.log %248 : vector<2x8x1xf32>
    %250 = arith.addf %249, %243 : vector<2x8x1xf32>
    %cst_61 = arith.constant 0.000000e+00 : f32
    %251 = vector.broadcast %cst_61 : f32 to vector<2x8x1xf32>
    %252 = arith.subf %251, %250 : vector<2x8x1xf32>
    %c9_i32 = arith.constant 9 : i32
    %253 = vector.broadcast %252 : vector<2x8x1xf32> to vector<2x8x8xf32>
    %254 = arith.addf %16, %253 : vector<2x8x8xf32>
    %cst_62 = arith.constant dense<0xFF800000> : vector<2x8xf32>
    %255 = vector.multi_reduction <maximumf>, %254, %cst_62 [1] : vector<2x8x8xf32> to vector<2x8xf32>
    %256 = vector.shape_cast %255 : vector<2x8xf32> to vector<2x1x8xf32>
    %257 = vector.broadcast %256 : vector<2x1x8xf32> to vector<2x8x8xf32>
    %258 = arith.subf %254, %257 : vector<2x8x8xf32>
    %259 = math.exp %258 : vector<2x8x8xf32>
    %cst_63 = arith.constant dense<0.000000e+00> : vector<2x8xf32>
    %260 = vector.multi_reduction <add>, %259, %cst_63 [1] : vector<2x8x8xf32> to vector<2x8xf32>
    %261 = vector.shape_cast %260 : vector<2x8xf32> to vector<2x1x8xf32>
    %262 = math.log %261 : vector<2x1x8xf32>
    %263 = arith.addf %262, %256 : vector<2x1x8xf32>
    %cst_64 = arith.constant 0.000000e+00 : f32
    %264 = vector.broadcast %cst_64 : f32 to vector<2x1x8xf32>
    %265 = arith.subf %264, %263 : vector<2x1x8xf32>
    %266 = vector.broadcast %265 : vector<2x1x8xf32> to vector<2x8x8xf32>
    %267 = arith.addf %16, %266 : vector<2x8x8xf32>
    %cst_65 = arith.constant dense<0xFF800000> : vector<2x8xf32>
    %268 = vector.multi_reduction <maximumf>, %267, %cst_65 [2] : vector<2x8x8xf32> to vector<2x8xf32>
    %269 = vector.shape_cast %268 : vector<2x8xf32> to vector<2x8x1xf32>
    %270 = vector.broadcast %269 : vector<2x8x1xf32> to vector<2x8x8xf32>
    %271 = arith.subf %267, %270 : vector<2x8x8xf32>
    %272 = math.exp %271 : vector<2x8x8xf32>
    %cst_66 = arith.constant dense<0.000000e+00> : vector<2x8xf32>
    %273 = vector.multi_reduction <add>, %272, %cst_66 [2] : vector<2x8x8xf32> to vector<2x8xf32>
    %274 = vector.shape_cast %273 : vector<2x8xf32> to vector<2x8x1xf32>
    %275 = math.log %274 : vector<2x8x1xf32>
    %276 = arith.addf %275, %269 : vector<2x8x1xf32>
    %cst_67 = arith.constant 0.000000e+00 : f32
    %277 = vector.broadcast %cst_67 : f32 to vector<2x8x1xf32>
    %278 = arith.subf %277, %276 : vector<2x8x1xf32>
    %279 = vector.broadcast %278 : vector<2x8x1xf32> to vector<2x8x8xf32>
    %280 = arith.addf %16, %279 : vector<2x8x8xf32>
    %281 = vector.broadcast %265 : vector<2x1x8xf32> to vector<2x8x8xf32>
    %282 = arith.addf %280, %281 : vector<2x8x8xf32>
    %cst_68 = arith.constant 0.000000e+00 : f32
    %283 = vector.broadcast %cst_68 : f32 to vector<2x8x8xf32>
    %284 = arith.select %10, %283, %282 : vector<2x8x8xi1>, vector<2x8x8xf32>
    %285 = math.exp %284 : vector<2x8x8xf32>
    %c0_69 = arith.constant 0 : index
    %c0_70 = arith.constant 0 : index
    %c0_71 = arith.constant 0 : index
    %286 = vector.load %arg2[%c0_69, %c0_70, %c0_71] : memref<2x8x8xf32, #tpu.memory_space<vmem>>, vector<2x8x8xf32>
    tpu.vector_store %arg2[%c0_69, %c0_70, %c0_71], %285 {strides = array<i32>} : memref<2x8x8xf32, #tpu.memory_space<vmem>>, vector<2x8x8xf32>,
    return
  }
  func.func @transform_0(%arg0: i32) -> (i32, i32, i32) {
    %c0_i32 = arith.constant 0 : i32
    %c0_i32_0 = arith.constant 0 : i32
    %c0_i32_1 = arith.constant 0 : i32
    return %arg0, %c0_i32, %c0_i32_0 : i32, i32, i32
  }
  func.func @transform_1(%arg0: i32) -> (i32, i32, i32) {
    %c0_i32 = arith.constant 0 : i32
    %c0_i32_0 = arith.constant 0 : i32
    %c0_i32_1 = arith.constant 0 : i32
    return %arg0, %c0_i32, %c0_i32_0 : i32, i32, i32
  }
}

</mosaic_0001>

<bundles_post_ra>
// kernel: tpu_custom_call.1
= control target key start
LH: loop header
LB: loop body
LE: loop exit
PB: predicated region body
PF: predicated region fallthrough
CT: control target
= control target key end

     0   :  { %6 = vsyncpa [#allocation3], 0  ;;  %s2691_s0 = inlined_call_operand.hbm [shape: f32[4,8,32], index: 0, kind: input, shape index: {}]   ;;  %s2692_s1 = inlined_call_operand.hbm [shape: f32[4,8,8], index: 1, kind: output, shape index: {}]  }
   0x1   :  { %8 = vsyncpa [#allocation3 + $0x1], 0 }
   0x2   :  { %9 = vsyncpa [#allocation4], 0 }
   0x3   :  { %11 = vsyncpa [#allocation4 + $0x1], 0  ;;  %s2337_s6 = smov 0   ;;  %s2339_s7 = smov 0  }
   0x4   :  { %s2341_s8 = smov 0   ;;  %s2343_s9 = smov 0  }
   0x5 LB: > { %s2358_s10 = sadd.s32 4294967295, %s2317_s9   ;;  %s1881_s11 = sadd.s32 4294967294, %s2317_s9   ;;  %s2317_s9 = sphi %s2343_s9, %s2705_s9   ;;  %s2313_s8 = sphi %s2341_s8, %s2704_s8   ;;  %s2309_s7 = sphi %s2339_s7, %s2703_s7   ;;  %s2305_s6 = sphi %s2337_s6, %s2702_s6  }
   0x6   : > { %s2362_s12 = sadd.s32 1, %s2317_s9   ;;  %s24_s13 = sadd.s32 1, %s2313_s8 }
   0x7   : > { %s21_s14 = ssub.s32 %s2317_s9, %s2362_s12  ;;  %p31_p0 = scmp.ne.s32.totalorder %s2313_s8, %s2309_s7 }
   0x8   : > { %p22_p1 = scmp.eq.s32.totalorder %s21_s14, 0  ;;  %p32_p2 = scmp.eq.s32.totalorder %s2317_s9, 0 }
   0x9   : > { %p37_p3 = scmp.ne.s32.totalorder %s2309_s7, %s2305_s6  ;;  %p38_p4 = scmp.eq.s32.totalorder %s2358_s10, 0 }
   0xa   : > { %s2374_s15 = scalar_select %p22_p1, %s2313_s8, %s24_s13  }
   0xb   : > { %p2376_p5 = por %p32_p2, %p31_p0  ;;  %p2380_p6 = por %p38_p4, %p37_p3 }
   0xc   : > { %p61_p7 = scmp.eq.s32.totalorder %s2358_s10, 1  ;;  %p67_p8 = scmp.eq.s32.totalorder %s1881_s11, 1 }
   0xd   : > { %p2013_p10 = scmp.lt.s32.totalorder %s2317_s9, 2  ;;  %s87_s20 = sand.u32 1, %s2313_s8  }
   0xe   : > { %p2387_p11 = por %p61_p7, %p31_p0  ;;  %p2391_p12 = por %p67_p8, %p37_p3 }
   0xf   : > { %s1895_s21 = sshll.u32 %s2317_s9, 8  ;;  %s1884_s22 = sshll.u32 %s87_s20, 4 }
  0x10   : > { %s2696_s18 = scalar_select %p2387_p11, 1, 0 }
  0x11   : > { %s2697_s19 = scalar_select %p2391_p12, 1, 0 }
  0x12   : > { %s2400_s25 = scalar_lea.hbm %s2691_s0, %s1895_s21  ;;  %s91_s26 = scalar_lea.vmem [#allocation2], %s1884_s22 }
  0x13   : > { %s98_s27 = sshll.u32 %s91_s26, 4  ;;  %p2404_p13 = pnand %p2013_p10, %p2376_p5  ;;  %s2408_s27 = int_to_ptr.vmem [resolvable:$true] %s98_s27 }
  0x14   : > { %s2410_s29 = scalar_lea.sflag [#allocation3], %s87_s20  ;;  %s2221_s30 = scalar_lea.hbm %s2400_s25, 256 }
  0x15   : > { %p2222_p0 = scmp.ne.s32.totalorder %s2400_s25, %s2221_s30  ;;  %p2223_p1 = pneg %p2404_p13 }
  0x16   : > { %s2226_s4 = scalar_lea.hbm %s2691_s0, 512  ;;  %p2227_p4 = scmp.lt.u32.totalorder %s2400_s25, %s2691_s0 }
  0x17   : > { %p2224_p2 = pnand %p2223_p1, %p2222_p0  ;;  %p2228_p5 = scmp.lt.u32.totalorder %s2226_s4, %s2221_s30 }
  0x18   : > { %p2230_p8 = scmp.lt.u32.totalorder %s2221_s30, %s2400_s25 }
  0x19   : > { %p2225_p3 = pneg %p2224_p2  ;;  %p2229_p7 = por %p2228_p5, %p2227_p4 }
  0x1b   : > { %p2231_p10 = por %p2230_p8, %p2229_p7 }
  0x1d   : > { %p2232_p9 = pnand %p2231_p10, %p2225_p3 }
  0x1f   : > { %2235 = shalt.err (!%p2232_p9)
}
  0x20   : > { %s2236_s13 = scalar_lea.vmem %s2408_s27, 256  ;;  %s2319_s14 = smov [#allocation2]  }
  0x21   : > { %p2237_p0 = scmp.ne.s32.totalorder %s2408_s27, %s2236_s13  ;;  %s2241_s16 = sshll.u32 %s2319_s14, 4  ;;  %s2242_s16 = int_to_ptr.vmem [resolvable:$false] %s2241_s16 }
  0x22   : > { %s2243_s20 = scalar_lea.vmem %s2242_s16, 512  ;;  %p2244_p11 = scmp.lt.s32.totalorder %s2408_s27, %s2242_s16 }
  0x23   : > { %p2239_p2 = pnand %p2237_p0, %p2223_p1  ;;  %p2245_p4 = scmp.lt.s32.totalorder %s2243_s20, %s2236_s13 }
  0x25   : > { %p2240_p12 = pneg %p2239_p2  ;;  %p2246_p5 = por %p2245_p4, %p2244_p11 }
  0x27   : > { %p2247_p7 = pnand %p2246_p5, %p2240_p12 }
  0x29   : > { %2250 = shalt.err (!%p2247_p7)
}
  0x2a   : > { %s2320_s21 = smov 128   ;;  %s2321_s22 = smov 8  }
  0x2b   : > { %2008 = dma.hbm_to_vmem [thread:$0]  (!%p2404_p13), %s2400_s25, 256, %s2408_s27, %s2410_s29, %s2320_s21, %s2320_s21, %s2321_s22  }
  0x2c   : > { %p1887_p9 = scmp.ge.s32.totalorder %s2317_s9, 1  ;;  %p106_p1 = scmp.lt.s32.totalorder %s2317_s9, 3 }
  0x2e   : > { %p107_p3 = pnand %p1887_p9, %p106_p1 }
  0x2f   : > { %s2441_s23 = sand.u32 (!%p107_p3), 1, %s2309_s7  }
  0x30   : > { %110 = sbr.rel (%p107_p3) target bundleno = 4318 (0x10de), region = 24  ;;  %s1888_s24 = sshll.u32 (!%p107_p3), %s2441_s23, 4 }
  0x31   : > { %s113_s26 = scalar_lea.sflag (!%p107_p3), [#allocation3], %s2441_s23  ;;  %s116_s30 = scalar_lea.vmem (!%p107_p3), [#allocation2], %s1888_s24 }
  0x37   : > { %2296 = dma.done.wait (%p2380_p6), %s113_s26, 256  }
  0x38   : > { %2298 = vsyncadd (%p2380_p6), %s113_s26, 4294967040  ;;  %v137_v0 = vld [vmem:[%s116_s30] sm:$0xff]  ;;  %vm141_vm0 = vcmask 261120   ;;  %v138_v1 = vld [vmem:[%s116_s30 + $0x8] sm:$0xff]  ;;  %v2322_v6 = vmov 0.0   ;;  %vm2323_vm1 = vmmov 0   ;;  %v1050_v25 = vlaneseq }
  0x39   : > { %v139_v2 = vmul.f32 %v137_v0, %v137_v0  ;;  %v140_v3 = vmul.f32 %v138_v1, %v138_v1  ;;  %1921 = vmatprep.subr.mxu0 %v2322_v6  ;;  %1951 = vmatprep.subr.mxu1 %v2322_v6  ;;  %vm1063_vm3 = vcmask 64512   ;;  %s1896_s17 = sshll.u32 %s2358_s10, 8  ;;  %s134_s25 = scalar_lea.vmem [#allocation5], %s1888_s24 }
  0x3a   : > { %1923 = vmatprep.mubr.msk.f32.mxu0 %vm2323_vm1, %v2322_v6  ;;  %1953 = vmatprep.mubr.msk.f32.mxu1 %vm2323_vm1, %v2322_v6  ;;  %v2491_v26 = vshrl.u32 %v1050_v25, 7  ;;  %v2493_v27 = vand.u32 127, %v1050_v25  ;;  %s1808_s27 = sshll.u32 %s134_s25, 4  ;;  %s2644_s2 = scalar_lea.hbm %s2692_s1, %s1896_s17  ;;  %s2646_s27 = int_to_ptr.vmem [resolvable:$true] %s1808_s27 }
  0x3b   : > { %v142_v4 = vsel %vm141_vm0, %v139_v2, 0.0  ;;  %v145_v5 = vsel %vm141_vm0, %v140_v3, 0.0  ;;  %s1795_s10 = scalar_lea.sflag [#allocation4], %s2441_s23  ;;  %s2251_s3 = scalar_lea.vmem %s2646_s27, 256 }
  0x3c   : > { %143 = vadd.xlane.f32.xlu0 %v142_v4  ;;  %vm1054_vm2 = vcmp.eq.s32.totalorder %v2491_v26, %v2493_v27  ;;  %p2252_p6 = scmp.ne.s32.totalorder %s2646_s27, %s2251_s3  ;;  %p2699_p11 = scmp.ne.s32.totalorder %s2696_s18, 0 }
  0x3d   : > { %s2324_s4 = smov [#allocation5]  }
  0x3e   : > { %p2253_p12 = pnand %p2252_p6, %p2699_p11  ;;  %s2255_s5 = sshll.u32 %s2324_s4, 4  ;;  %s2256_s5 = int_to_ptr.vmem [resolvable:$false] %s2255_s5 }
  0x3f   : > { %s2257_s11 = scalar_lea.vmem %s2256_s5, 512  ;;  %p2258_p8 = scmp.lt.s32.totalorder %s2646_s27, %s2256_s5 }
  0x40   : > { %146 = vadd.xlane.f32.xlu0 %v145_v5  ;;  %p2254_p13 = pneg %p2253_p12  ;;  %p2259_p10 = scmp.lt.s32.totalorder %s2257_s11, %s2251_s3 }
  0x42   : > { %p2260_p0 = por %p2259_p10, %p2258_p8 }
  0x44   : > { %p2261_p2 = pnand %p2260_p0, %p2254_p13 }
  0xc9   : > { %v144_v7 = vpop.xlane.xlu0 %143 }
  0xca   : > { %2053 = vrsqrt.f32 %v144_v7 }
  0xcd   : > { %v147_v8 = vpop.xlane.xlu0 %146 }
  0xce   : > { %2055 = vrsqrt.f32 %v147_v8 }
  0xd4   : > { %v2054_v9 = vpop.eup %2053 }
  0xd5   : > { %v150_v10 = vmul.f32 %v2054_v9, %v137_v0 }
  0xd7   : > { %v153_v11 = vsel %vm141_vm0, %v150_v10, 0 }
  0xd8   : > { %v2056_v12 = vpop.eup %2055  ;;  %v156_v13 = vand.u32 4294901760, %v153_v11 }
  0xd9   : > { %v151_v14 = vmul.f32 %v2056_v12, %v138_v1 }
  0xda   : > { %1922 = vmatpush3.xpose.msra.mxu0 %v156_v13  ;;  %v222_v15 = vsub.f32 %v153_v11, %v156_v13 }
  0xdb   : > { %v602_v16 = vsel %vm141_vm0, %v151_v14, 0  ;;  %1926 = vmatprep.subr.mxu0 %v2322_v6 }
  0xdc   : > { %v605_v17 = vand.u32 4294901760, %v602_v16  ;;  %v223_v18 = vand.u32 4294901760, %v222_v15 }
  0xde   : > { %1952 = vmatpush3.xpose.msra.mxu1 %v605_v17  ;;  %v224_v19 = vsub.f32 %v222_v15, %v223_v18  ;;  %v671_v20 = vsub.f32 %v602_v16, %v605_v17 }
  0xdf   : > { %1956 = vmatprep.subr.mxu1 %v2322_v6 }
  0xe0   : > { %v225_v21 = vand.u32 4294901760, %v224_v19  ;;  %v672_v22 = vand.u32 4294901760, %v671_v20 }
  0xe2   : > { %1924 = vmatmul.mubr.f32.vlgmr.msra.gmra.mrb[0].mxu0 %v225_v21  ;;  %v673_v23 = vsub.f32 %v671_v20, %v672_v22 }
  0xe3   : > { %1927 = vmatpush3.xpose.msra.mxu0 %v225_v21  ;;  %1928 = vmatprep.mubr.msk.f32.mxu0 %vm2323_vm1, %v2322_v6 }
  0xe4   : > { %v674_v24 = vand.u32 4294901760, %v673_v23  ;;  %1931 = vmatprep.subr.mxu0 %v2322_v6 }
  0xe6   : > { %1954 = vmatmul.mubr.f32.vlgmr.msra.gmra.mrb[0].mxu1 %v674_v24 }
  0xe7   : > { %1957 = vmatpush3.xpose.msra.mxu1 %v674_v24  ;;  %1958 = vmatprep.mubr.msk.f32.mxu1 %vm2323_vm1, %v2322_v6 }
  0xe8   : > { %1961 = vmatprep.subr.mxu1 %v2322_v6 }
  0xea   : > { %1929 = vmatmul.mubr.f32.vlgmr.msra.gmra.mrb[0].mxu0 %v156_v13 }
  0xeb   : > { %1932 = vmatpush3.xpose.msra.mxu0 %v222_v15  ;;  %1933 = vmatprep.mubr.msk.f32.mxu0 %vm2323_vm1, %v2322_v6 }
  0xec   : > { %1936 = vmatprep.subr.mxu0 %v2322_v6 }
  0xee   : > { %1959 = vmatmul.mubr.f32.vlgmr.msra.gmra.mrb[0].mxu1 %v605_v17 }
  0xef   : > { %1962 = vmatpush3.xpose.msra.mxu1 %v671_v20  ;;  %1963 = vmatprep.mubr.msk.f32.mxu1 %vm2323_vm1, %v2322_v6 }
  0xf0   : > { %1966 = vmatprep.subr.mxu1 %v2322_v6 }
  0xf2   : > { %1934 = vmatmul.mubr.f32.vlgmr.msra.gmra.mrb[0].mxu0 %v222_v15 }
  0xf3   : > { %1937 = vmatpush3.xpose.msra.mxu0 %v156_v13  ;;  %1938 = vmatprep.mubr.msk.f32.mxu0 %vm2323_vm1, %v2322_v6 }
  0xf4   : > { %1941 = vmatprep.subr.mxu0 %v2322_v6 }
  0xf6   : > { %1964 = vmatmul.mubr.f32.vlgmr.msra.gmra.mrb[0].mxu1 %v671_v20 }
  0xf7   : > { %1967 = vmatpush3.xpose.msra.mxu1 %v605_v17  ;;  %1968 = vmatprep.mubr.msk.f32.mxu1 %vm2323_vm1, %v2322_v6 }
  0xf8   : > { %1971 = vmatprep.subr.mxu1 %v2322_v6 }
  0xfa   : > { %1939 = vmatmul.mubr.f32.vlgmr.msra.gmra.mrb[0].mxu0 %v223_v18 }
  0xfb   : > { %1942 = vmatpush3.xpose.msra.mxu0 %v223_v18  ;;  %1943 = vmatprep.mubr.msk.f32.mxu0 %vm2323_vm1, %v2322_v6 }
  0xfc   : > { %1946 = vmatprep.subr.mxu0 %v2322_v6 }
  0xfe   : > { %1969 = vmatmul.mubr.f32.vlgmr.msra.gmra.mrb[0].mxu1 %v672_v22 }
  0xff   : > { %1972 = vmatpush3.xpose.msra.mxu1 %v672_v22  ;;  %1973 = vmatprep.mubr.msk.f32.mxu1 %vm2323_vm1, %v2322_v6 }
 0x100   : > { %1976 = vmatprep.subr.mxu1 %v2322_v6 }
 0x102   : > { %1944 = vmatmul.mubr.f32.vlgmr.msra.gmra.mrb[0].mxu0 %v156_v13 }
 0x103   : > { %1947 = vmatpush3.xpose.msra.mxu0 %v156_v13  ;;  %1948 = vmatprep.mubr.msk.f32.mxu0 %vm2323_vm1, %v2322_v6 }
 0x106   : > { %1974 = vmatmul.mubr.f32.vlgmr.msra.gmra.mrb[0].mxu1 %v605_v17 }
 0x107   : > { %1977 = vmatpush3.xpose.msra.mxu1 %v605_v17  ;;  %1978 = vmatprep.mubr.msk.f32.mxu1 %vm2323_vm1, %v2322_v6 }
 0x10a   : > { %1949 = vmatmul.mubr.f32.vlgmr.msra.gmra.mrb[0].mxu0 %v156_v13 }
 0x10e   : > { %1979 = vmatmul.mubr.f32.vlgmr.msra.gmra.mrb[0].mxu1 %v605_v17 }
 0x1dd   : > { %v597_v28 = vpop.f32.mrb[0].mxu0 }
 0x1de   : > { %v1055_v29 = vsub.f32 1.0, %v597_v28  ;;  %v1950_v30 = vpop.f32.mrb[1].mxu0 }
 0x1e0   : > { %v1057_v31 = vmul.f32 -50.0, %v1055_v29 }
 0x1e1   : > { %v1046_v32 = vpop.f32.mrb[0].mxu1 }
 0x1e2   : > { %v2500_v33 = vsel %vm1054_vm2, -2500000.0, %v1057_v31  ;;  %v1056_v34 = vsub.f32 1.0, %v1046_v32  ;;  %v1980_v35 = vpop.f32.mrb[1].mxu1 }
 0x1e3   : > { %v1064_v36 = vsel %vm1063_vm3, %v2500_v33, -inf }
 0x1e4   : > { %v1058_v37 = vmul.f32 -50.0, %v1056_v34  ;;  %v1065_v38 = vrot.slane %v1064_v36, 4 }
 0x1e6   : > { %v2507_v39 = vsel %vm1054_vm2, -2500000.0, %v1058_v37  ;;  %v1066_v40 = vmax.f32 %v1064_v36, %v1065_v38 }
 0x1e7   : > { %v1071_v41 = vsel %vm1063_vm3, %v2507_v39, -inf }
 0x1e8   : > { %v1067_v42 = vrot.slane %v1066_v40, 2  ;;  %v1072_v43 = vrot.slane %v1071_v41, 4 }
 0x1ea   : > { %v1068_v44 = vmax.f32 %v1066_v40, %v1067_v42  ;;  %v1073_v45 = vmax.f32 %v1071_v41, %v1072_v43 }
 0x1ec   : > { %v1069_v46 = vrot.slane %v1068_v44, 1  ;;  %v1074_v47 = vrot.slane %v1073_v45, 2 }
 0x1ee   : > { %v1070_v48 = vmax.f32 %v1068_v44, %v1069_v46  ;;  %v1075_v49 = vmax.f32 %v1073_v45, %v1074_v47 }
 0x1f0   : > { %v1078_v50 = vsub.f32 %v2500_v33, %v1070_v48  ;;  %v1076_v51 = vrot.slane %v1075_v49, 1 }
 0x1f2   : > { %v1080_v52 = vmul.f32 1.442695, %v1078_v50  ;;  %v1077_v53 = vmax.f32 %v1075_v49, %v1076_v51 }
 0x1f4   : > { %2057 = vpow2.f32 %v1080_v52  ;;  %v1079_v54 = vsub.f32 %v2507_v39, %v1077_v53 }
 0x1f6   : > { %v1082_v55 = vmul.f32 1.442695, %v1079_v54 }
 0x1f8   : > { %2059 = vpow2.f32 %v1082_v55 }
 0x1fe   : > { %v2058_v56 = vpop.eup %2057 }
 0x1ff   : > { %v1084_v57 = vsel %vm1063_vm3, %v2058_v56, 0.0 }
 0x200   : > { %v1085_v58 = vrot.slane %v1084_v57, 4 }
 0x202   : > { %v2060_v59 = vpop.eup %2059  ;;  %v1086_v60 = vadd.f32 %v1085_v58, %v1084_v57 }
 0x203   : > { %v1091_v61 = vsel %vm1063_vm3, %v2060_v59, 0.0 }
 0x204   : > { %v1087_v62 = vrot.slane %v1086_v60, 2  ;;  %v1092_v63 = vrot.slane %v1091_v61, 4 }
 0x206   : > { %v1088_v0 = vadd.f32 %v1087_v62, %v1086_v60  ;;  %v1093_v1 = vadd.f32 %v1092_v63, %v1091_v61 }
 0x208   : > { %v1089_v2 = vrot.slane %v1088_v0, 1  ;;  %v1094_v3 = vrot.slane %v1093_v1, 2 }
 0x20a   : > { %v1090_v4 = vadd.f32 %v1089_v2, %v1088_v0  ;;  %v1095_v5 = vadd.f32 %v1094_v3, %v1093_v1 }
 0x20c   : > { %2061 = vlog2.f32 %v1090_v4  ;;  %v1096_v6 = vrot.slane %v1095_v5, 1 }
 0x20e   : > { %v1097_v7 = vadd.f32 %v1096_v6, %v1095_v5 }
 0x210   : > { %2063 = vlog2.f32 %v1097_v7 }
 0x216   : > { %v2062_v8 = vpop.eup %2061 }
 0x217   : > { %v1099_v9 = vmul.f32 0.6931472, %v2062_v8 }
 0x219   : > { %v1102_v10 = vadd.f32 %v1099_v9, %v1070_v48 }
 0x21a   : > { %v2064_v11 = vpop.eup %2063 }
 0x21b   : > { %v1104_v12 = vsub.f32 0.0, %v1102_v10  ;;  %v1101_v13 = vmul.f32 0.6931472, %v2064_v11 }
 0x21d   : > { %v1106_v14 = vadd.f32 %v1104_v12, %v2500_v33  ;;  %v1103_v15 = vadd.f32 %v1101_v13, %v1077_v53 }
 0x21f   : > { %v1108_v16 = vsel %vm1063_vm3, %v1106_v14, -inf  ;;  %v1105_v17 = vsub.f32 0.0, %v1103_v15 }
 0x220   : > { %1109 = vmax.xlane.f32.xlu1 %v1108_v16 }
 0x221   : > { %v1107_v18 = vadd.f32 %v1105_v17, %v2507_v39 }
 0x223   : > { %v1111_v19 = vsel %vm1063_vm3, %v1107_v18, -inf }
 0x224   : > { %1112 = vmax.xlane.f32.xlu1 %v1111_v19 }
 0x2ad   : > { %v1110_v20 = vpop.xlane.xlu1 %1109 }
 0x2ae   : > { %v1114_v21 = vsub.f32 %v1106_v14, %v1110_v20 }
 0x2b0   : > { %v1116_v22 = vmul.f32 1.442695, %v1114_v21 }
 0x2b1   : > { %v1113_v23 = vpop.xlane.xlu1 %1112 }
 0x2b2   : > { %2065 = vpow2.f32 %v1116_v22  ;;  %v1115_v24 = vsub.f32 %v1107_v18, %v1113_v23 }
 0x2b4   : > { %v1118_v25 = vmul.f32 1.442695, %v1115_v24 }
 0x2b6   : > { %2067 = vpow2.f32 %v1118_v25 }
 0x2bc   : > { %v2066_v28 = vpop.eup %2065 }
 0x2bd   : > { %v1120_v29 = vsel %vm1063_vm3, %v2066_v28, 0.0 }
 0x2be   : > { %1121 = vadd.xlane.f32.xlu0 %v1120_v29 }
 0x2c0   : > { %v2068_v30 = vpop.eup %2067 }
 0x2c1   : > { %v1123_v31 = vsel %vm1063_vm3, %v2068_v30, 0.0 }
 0x2c2   : > { %1124 = vadd.xlane.f32.xlu1 %v1123_v31 }
 0x34b   : > { %v1122_v32 = vpop.xlane.xlu0 %1121 }
 0x34c   : > { %2069 = vlog2.f32 %v1122_v32 }
 0x34f   : > { %v1125_v34 = vpop.xlane.xlu1 %1124 }
 0x350   : > { %2071 = vlog2.f32 %v1125_v34 }
 0x356   : > { %v2070_v35 = vpop.eup %2069 }
 0x357   : > { %v1127_v36 = vmul.f32 0.6931472, %v2070_v35 }
 0x359   : > { %v1130_v37 = vadd.f32 %v1127_v36, %v1110_v20 }
 0x35a   : > { %v2072_v38 = vpop.eup %2071 }
 0x35b   : > { %v1132_v40 = vsub.f32 0.0, %v1130_v37  ;;  %v1129_v41 = vmul.f32 0.6931472, %v2072_v38 }
 0x35d   : > { %v1134_v42 = vadd.f32 %v1132_v40, %v2500_v33  ;;  %v1131_v43 = vadd.f32 %v1129_v41, %v1113_v23 }
 0x35f   : > { %v1136_v44 = vsel %vm1063_vm3, %v1134_v42, -inf  ;;  %v1133_v45 = vsub.f32 0.0, %v1131_v43 }
 0x360   : > { %v1137_v46 = vrot.slane %v1136_v44, 4 }
 0x361   : > { %v1135_v47 = vadd.f32 %v1133_v45, %v2507_v39 }
 0x362   : > { %v1138_v48 = vmax.f32 %v1136_v44, %v1137_v46 }
 0x363   : > { %v1143_v49 = vsel %vm1063_vm3, %v1135_v47, -inf }
 0x364   : > { %v1144_v50 = vrot.slane %v1143_v49, 4  ;;  %v1139_v51 = vrot.slane %v1138_v48, 2 }
 0x366   : > { %v1145_v52 = vmax.f32 %v1143_v49, %v1144_v50  ;;  %v1140_v53 = vmax.f32 %v1138_v48, %v1139_v51 }
 0x368   : > { %v1141_v54 = vrot.slane %v1140_v53, 1  ;;  %v1146_v55 = vrot.slane %v1145_v52, 2 }
 0x36a   : > { %v1142_v56 = vmax.f32 %v1140_v53, %v1141_v54  ;;  %v1147_v57 = vmax.f32 %v1145_v52, %v1146_v55 }
 0x36c   : > { %v1150_v58 = vsub.f32 %v1134_v42, %v1142_v56  ;;  %v1148_v59 = vrot.slane %v1147_v57, 1 }
 0x36e   : > { %v1152_v60 = vmul.f32 1.442695, %v1150_v58  ;;  %v1149_v61 = vmax.f32 %v1147_v57, %v1148_v59 }
 0x370   : > { %2073 = vpow2.f32 %v1152_v60  ;;  %v1151_v62 = vsub.f32 %v1135_v47, %v1149_v61 }
 0x372   : > { %v1154_v63 = vmul.f32 1.442695, %v1151_v62 }
 0x374   : > { %2075 = vpow2.f32 %v1154_v63 }
 0x37a   : > { %v2074_v0 = vpop.eup %2073 }
 0x37b   : > { %v1156_v1 = vsel %vm1063_vm3, %v2074_v0, 0.0 }
 0x37c   : > { %v1157_v2 = vrot.slane %v1156_v1, 4 }
 0x37e   : > { %v2076_v3 = vpop.eup %2075  ;;  %v1158_v4 = vadd.f32 %v1157_v2, %v1156_v1 }
 0x37f   : > { %v1163_v5 = vsel %vm1063_vm3, %v2076_v3, 0.0 }
 0x380   : > { %v1159_v6 = vrot.slane %v1158_v4, 2  ;;  %v1164_v7 = vrot.slane %v1163_v5, 4 }
 0x382   : > { %v1160_v8 = vadd.f32 %v1159_v6, %v1158_v4  ;;  %v1165_v9 = vadd.f32 %v1164_v7, %v1163_v5 }
 0x384   : > { %v1161_v10 = vrot.slane %v1160_v8, 1  ;;  %v1166_v11 = vrot.slane %v1165_v9, 2 }
 0x386   : > { %v1162_v12 = vadd.f32 %v1161_v10, %v1160_v8  ;;  %v1167_v13 = vadd.f32 %v1166_v11, %v1165_v9 }
 0x388   : > { %2077 = vlog2.f32 %v1162_v12  ;;  %v1168_v14 = vrot.slane %v1167_v13, 1 }
 0x38a   : > { %v1169_v15 = vadd.f32 %v1168_v14, %v1167_v13 }
 0x38c   : > { %2079 = vlog2.f32 %v1169_v15 }
 0x392   : > { %v2078_v16 = vpop.eup %2077 }
 0x393   : > { %v1171_v17 = vmul.f32 0.6931472, %v2078_v16 }
 0x395   : > { %v1174_v18 = vadd.f32 %v1171_v17, %v1142_v56 }
 0x396   : > { %v2080_v19 = vpop.eup %2079 }
 0x397   : > { %v1176_v20 = vsub.f32 0.0, %v1174_v18  ;;  %v1173_v21 = vmul.f32 0.6931472, %v2080_v19 }
 0x399   : > { %v1178_v22 = vadd.f32 %v1176_v20, %v2500_v33  ;;  %v1175_v23 = vadd.f32 %v1173_v21, %v1149_v61 }
 0x39b   : > { %v1180_v24 = vsel %vm1063_vm3, %v1178_v22, -inf  ;;  %v1177_v25 = vsub.f32 0.0, %v1175_v23 }
 0x39c   : > { %1181 = vmax.xlane.f32.xlu0 %v1180_v24 }
 0x39d   : > { %v1179_v28 = vadd.f32 %v1177_v25, %v2507_v39 }
 0x39f   : > { %v1183_v29 = vsel %vm1063_vm3, %v1179_v28, -inf }
 0x3a0   : > { %1184 = vmax.xlane.f32.xlu1 %v1183_v29 }
 0x429   : > { %v1182_v30 = vpop.xlane.xlu0 %1181 }
 0x42a   : > { %v1186_v31 = vsub.f32 %v1178_v22, %v1182_v30 }
 0x42c   : > { %v1188_v32 = vmul.f32 1.442695, %v1186_v31 }
 0x42d   : > { %v1185_v34 = vpop.xlane.xlu1 %1184 }
 0x42e   : > { %2081 = vpow2.f32 %v1188_v32  ;;  %v1187_v35 = vsub.f32 %v1179_v28, %v1185_v34 }
 0x430   : > { %v1190_v36 = vmul.f32 1.442695, %v1187_v35 }
 0x432   : > { %2083 = vpow2.f32 %v1190_v36 }
 0x438   : > { %v2082_v37 = vpop.eup %2081 }
 0x439   : > { %v1192_v38 = vsel %vm1063_vm3, %v2082_v37, 0.0 }
 0x43a   : > { %1193 = vadd.xlane.f32.xlu0 %v1192_v38 }
 0x43c   : > { %v2084_v40 = vpop.eup %2083 }
 0x43d   : > { %v1195_v41 = vsel %vm1063_vm3, %v2084_v40, 0.0 }
 0x43e   : > { %1196 = vadd.xlane.f32.xlu1 %v1195_v41 }
 0x4c7   : > { %v1194_v42 = vpop.xlane.xlu0 %1193 }
 0x4c8   : > { %2085 = vlog2.f32 %v1194_v42 }
 0x4cb   : > { %v1197_v43 = vpop.xlane.xlu1 %1196 }
 0x4cc   : > { %2087 = vlog2.f32 %v1197_v43 }
 0x4d2   : > { %v2086_v44 = vpop.eup %2085 }
 0x4d3   : > { %v1199_v45 = vmul.f32 0.6931472, %v2086_v44 }
 0x4d5   : > { %v1202_v46 = vadd.f32 %v1199_v45, %v1182_v30 }
 0x4d6   : > { %v2088_v47 = vpop.eup %2087 }
 0x4d7   : > { %v1204_v48 = vsub.f32 0.0, %v1202_v46  ;;  %v1201_v49 = vmul.f32 0.6931472, %v2088_v47 }
 0x4d9   : > { %v1206_v50 = vadd.f32 %v1204_v48, %v2500_v33  ;;  %v1203_v51 = vadd.f32 %v1201_v49, %v1185_v34 }
 0x4db   : > { %v1208_v52 = vsel %vm1063_vm3, %v1206_v50, -inf  ;;  %v1205_v53 = vsub.f32 0.0, %v1203_v51 }
 0x4dc   : > { %v1209_v54 = vrot.slane %v1208_v52, 4 }
 0x4dd   : > { %v1207_v55 = vadd.f32 %v1205_v53, %v2507_v39 }
 0x4de   : > { %v1210_v56 = vmax.f32 %v1208_v52, %v1209_v54 }
 0x4df   : > { %v1215_v57 = vsel %vm1063_vm3, %v1207_v55, -inf }
 0x4e0   : > { %v1216_v58 = vrot.slane %v1215_v57, 4  ;;  %v1211_v59 = vrot.slane %v1210_v56, 2 }
 0x4e2   : > { %v1217_v60 = vmax.f32 %v1215_v57, %v1216_v58  ;;  %v1212_v61 = vmax.f32 %v1210_v56, %v1211_v59 }
 0x4e4   : > { %v1213_v62 = vrot.slane %v1212_v61, 1  ;;  %v1218_v63 = vrot.slane %v1217_v60, 2 }
 0x4e6   : > { %v1214_v0 = vmax.f32 %v1212_v61, %v1213_v62  ;;  %v1219_v1 = vmax.f32 %v1217_v60, %v1218_v63 }
 0x4e8   : > { %v1222_v2 = vsub.f32 %v1206_v50, %v1214_v0  ;;  %v1220_v3 = vrot.slane %v1219_v1, 1 }
 0x4ea   : > { %v1224_v4 = vmul.f32 1.442695, %v1222_v2  ;;  %v1221_v5 = vmax.f32 %v1219_v1, %v1220_v3 }
 0x4ec   : > { %2089 = vpow2.f32 %v1224_v4  ;;  %v1223_v6 = vsub.f32 %v1207_v55, %v1221_v5 }
 0x4ee   : > { %v1226_v7 = vmul.f32 1.442695, %v1223_v6 }
 0x4f0   : > { %2091 = vpow2.f32 %v1226_v7 }
 0x4f6   : > { %v2090_v8 = vpop.eup %2089 }
 0x4f7   : > { %v1228_v9 = vsel %vm1063_vm3, %v2090_v8, 0.0 }
 0x4f8   : > { %v1229_v10 = vrot.slane %v1228_v9, 4 }
 0x4fa   : > { %v2092_v11 = vpop.eup %2091  ;;  %v1230_v12 = vadd.f32 %v1229_v10, %v1228_v9 }
 0x4fb   : > { %v1235_v13 = vsel %vm1063_vm3, %v2092_v11, 0.0 }
 0x4fc   : > { %v1231_v14 = vrot.slane %v1230_v12, 2  ;;  %v1236_v15 = vrot.slane %v1235_v13, 4 }
 0x4fe   : > { %v1232_v16 = vadd.f32 %v1231_v14, %v1230_v12  ;;  %v1237_v17 = vadd.f32 %v1236_v15, %v1235_v13 }
 0x500   : > { %v1233_v18 = vrot.slane %v1232_v16, 1  ;;  %v1238_v19 = vrot.slane %v1237_v17, 2 }
 0x502   : > { %v1234_v20 = vadd.f32 %v1233_v18, %v1232_v16  ;;  %v1239_v21 = vadd.f32 %v1238_v19, %v1237_v17 }
 0x504   : > { %2093 = vlog2.f32 %v1234_v20  ;;  %v1240_v22 = vrot.slane %v1239_v21, 1 }
 0x506   : > { %v1241_v23 = vadd.f32 %v1240_v22, %v1239_v21 }
 0x508   : > { %2095 = vlog2.f32 %v1241_v23 }
 0x50e   : > { %v2094_v24 = vpop.eup %2093 }
 0x50f   : > { %v1243_v25 = vmul.f32 0.6931472, %v2094_v24 }
 0x511   : > { %v1246_v28 = vadd.f32 %v1243_v25, %v1214_v0 }
 0x512   : > { %v2096_v29 = vpop.eup %2095 }
 0x513   : > { %v1248_v30 = vsub.f32 0.0, %v1246_v28  ;;  %v1245_v31 = vmul.f32 0.6931472, %v2096_v29 }
 0x515   : > { %v1250_v32 = vadd.f32 %v1248_v30, %v2500_v33  ;;  %v1247_v34 = vadd.f32 %v1245_v31, %v1221_v5 }
 0x517   : > { %v1252_v35 = vsel %vm1063_vm3, %v1250_v32, -inf  ;;  %v1249_v36 = vsub.f32 0.0, %v1247_v34 }
 0x518   : > { %1253 = vmax.xlane.f32.xlu0 %v1252_v35 }
 0x519   : > { %v1251_v37 = vadd.f32 %v1249_v36, %v2507_v39 }
 0x51b   : > { %v1255_v38 = vsel %vm1063_vm3, %v1251_v37, -inf }
 0x51c   : > { %1256 = vmax.xlane.f32.xlu1 %v1255_v38 }
 0x5a5   : > { %v1254_v40 = vpop.xlane.xlu0 %1253 }
 0x5a6   : > { %v1258_v41 = vsub.f32 %v1250_v32, %v1254_v40 }
 0x5a8   : > { %v1260_v42 = vmul.f32 1.442695, %v1258_v41 }
 0x5a9   : > { %v1257_v43 = vpop.xlane.xlu1 %1256 }
 0x5aa   : > { %2097 = vpow2.f32 %v1260_v42  ;;  %v1259_v44 = vsub.f32 %v1251_v37, %v1257_v43 }
 0x5ac   : > { %v1262_v45 = vmul.f32 1.442695, %v1259_v44 }
 0x5ae   : > { %2099 = vpow2.f32 %v1262_v45 }
 0x5b4   : > { %v2098_v46 = vpop.eup %2097 }
 0x5b5   : > { %v1264_v47 = vsel %vm1063_vm3, %v2098_v46, 0.0 }
 0x5b6   : > { %1265 = vadd.xlane.f32.xlu0 %v1264_v47 }
 0x5b8   : > { %v2100_v48 = vpop.eup %2099 }
 0x5b9   : > { %v1267_v49 = vsel %vm1063_vm3, %v2100_v48, 0.0 }
 0x5ba   : > { %1268 = vadd.xlane.f32.xlu1 %v1267_v49 }
 0x643   : > { %v1266_v50 = vpop.xlane.xlu0 %1265 }
 0x644   : > { %2101 = vlog2.f32 %v1266_v50 }
 0x647   : > { %v1269_v51 = vpop.xlane.xlu1 %1268 }
 0x648   : > { %2103 = vlog2.f32 %v1269_v51 }
 0x64e   : > { %v2102_v52 = vpop.eup %2101 }
 0x64f   : > { %v1271_v53 = vmul.f32 0.6931472, %v2102_v52 }
 0x651   : > { %v1274_v54 = vadd.f32 %v1271_v53, %v1254_v40 }
 0x652   : > { %v2104_v55 = vpop.eup %2103 }
 0x653   : > { %v1276_v56 = vsub.f32 0.0, %v1274_v54  ;;  %v1273_v57 = vmul.f32 0.6931472, %v2104_v55 }
 0x655   : > { %v1278_v58 = vadd.f32 %v1276_v56, %v2500_v33  ;;  %v1275_v59 = vadd.f32 %v1273_v57, %v1257_v43 }
 0x657   : > { %v1280_v60 = vsel %vm1063_vm3, %v1278_v58, -inf  ;;  %v1277_v61 = vsub.f32 0.0, %v1275_v59 }
 0x658   : > { %v1281_v62 = vrot.slane %v1280_v60, 4 }
 0x659   : > { %v1279_v63 = vadd.f32 %v1277_v61, %v2507_v39 }
 0x65a   : > { %v1282_v0 = vmax.f32 %v1280_v60, %v1281_v62 }
 0x65b   : > { %v1287_v1 = vsel %vm1063_vm3, %v1279_v63, -inf }
 0x65c   : > { %v1288_v2 = vrot.slane %v1287_v1, 4  ;;  %v1283_v3 = vrot.slane %v1282_v0, 2 }
 0x65e   : > { %v1289_v4 = vmax.f32 %v1287_v1, %v1288_v2  ;;  %v1284_v5 = vmax.f32 %v1282_v0, %v1283_v3 }
 0x660   : > { %v1285_v6 = vrot.slane %v1284_v5, 1  ;;  %v1290_v7 = vrot.slane %v1289_v4, 2 }
 0x662   : > { %v1286_v8 = vmax.f32 %v1284_v5, %v1285_v6  ;;  %v1291_v9 = vmax.f32 %v1289_v4, %v1290_v7 }
 0x664   : > { %v1294_v10 = vsub.f32 %v1278_v58, %v1286_v8  ;;  %v1292_v11 = vrot.slane %v1291_v9, 1 }
 0x666   : > { %v1296_v12 = vmul.f32 1.442695, %v1294_v10  ;;  %v1293_v13 = vmax.f32 %v1291_v9, %v1292_v11 }
 0x668   : > { %2105 = vpow2.f32 %v1296_v12  ;;  %v1295_v14 = vsub.f32 %v1279_v63, %v1293_v13 }
 0x66a   : > { %v1298_v15 = vmul.f32 1.442695, %v1295_v14 }
 0x66c   : > { %2107 = vpow2.f32 %v1298_v15 }
 0x672   : > { %v2106_v16 = vpop.eup %2105 }
 0x673   : > { %v1300_v17 = vsel %vm1063_vm3, %v2106_v16, 0.0 }
 0x674   : > { %v1301_v18 = vrot.slane %v1300_v17, 4 }
 0x676   : > { %v2108_v19 = vpop.eup %2107  ;;  %v1302_v20 = vadd.f32 %v1301_v18, %v1300_v17 }
 0x677   : > { %v1307_v21 = vsel %vm1063_vm3, %v2108_v19, 0.0 }
 0x678   : > { %v1303_v22 = vrot.slane %v1302_v20, 2  ;;  %v1308_v23 = vrot.slane %v1307_v21, 4 }
 0x67a   : > { %v1304_v24 = vadd.f32 %v1303_v22, %v1302_v20  ;;  %v1309_v25 = vadd.f32 %v1308_v23, %v1307_v21 }
 0x67c   : > { %v1305_v28 = vrot.slane %v1304_v24, 1  ;;  %v1310_v29 = vrot.slane %v1309_v25, 2 }
 0x67e   : > { %v1306_v30 = vadd.f32 %v1305_v28, %v1304_v24  ;;  %v1311_v31 = vadd.f32 %v1310_v29, %v1309_v25 }
 0x680   : > { %2109 = vlog2.f32 %v1306_v30  ;;  %v1312_v32 = vrot.slane %v1311_v31, 1 }
 0x682   : > { %v1313_v34 = vadd.f32 %v1312_v32, %v1311_v31 }
 0x684   : > { %2111 = vlog2.f32 %v1313_v34 }
 0x68a   : > { %v2110_v35 = vpop.eup %2109 }
 0x68b   : > { %v1315_v36 = vmul.f32 0.6931472, %v2110_v35 }
 0x68d   : > { %v1318_v37 = vadd.f32 %v1315_v36, %v1286_v8 }
 0x68e   : > { %v2112_v38 = vpop.eup %2111 }
 0x68f   : > { %v1320_v40 = vsub.f32 0.0, %v1318_v37  ;;  %v1317_v41 = vmul.f32 0.6931472, %v2112_v38 }
 0x691   : > { %v1322_v42 = vadd.f32 %v1320_v40, %v2500_v33  ;;  %v1319_v43 = vadd.f32 %v1317_v41, %v1293_v13 }
 0x693   : > { %v1324_v44 = vsel %vm1063_vm3, %v1322_v42, -inf  ;;  %v1321_v45 = vsub.f32 0.0, %v1319_v43 }
 0x694   : > { %1325 = vmax.xlane.f32.xlu0 %v1324_v44 }
 0x695   : > { %v1323_v46 = vadd.f32 %v1321_v45, %v2507_v39 }
 0x697   : > { %v1327_v47 = vsel %vm1063_vm3, %v1323_v46, -inf }
 0x698   : > { %1328 = vmax.xlane.f32.xlu1 %v1327_v47 }
 0x721   : > { %v1326_v48 = vpop.xlane.xlu0 %1325 }
 0x722   : > { %v1330_v49 = vsub.f32 %v1322_v42, %v1326_v48 }
 0x724   : > { %v1332_v50 = vmul.f32 1.442695, %v1330_v49 }
 0x725   : > { %v1329_v51 = vpop.xlane.xlu1 %1328 }
 0x726   : > { %2113 = vpow2.f32 %v1332_v50  ;;  %v1331_v52 = vsub.f32 %v1323_v46, %v1329_v51 }
 0x728   : > { %v1334_v53 = vmul.f32 1.442695, %v1331_v52 }
 0x72a   : > { %2115 = vpow2.f32 %v1334_v53 }
 0x730   : > { %v2114_v54 = vpop.eup %2113 }
 0x731   : > { %v1336_v55 = vsel %vm1063_vm3, %v2114_v54, 0.0 }
 0x732   : > { %1337 = vadd.xlane.f32.xlu0 %v1336_v55 }
 0x734   : > { %v2116_v56 = vpop.eup %2115 }
 0x735   : > { %v1339_v57 = vsel %vm1063_vm3, %v2116_v56, 0.0 }
 0x736   : > { %1340 = vadd.xlane.f32.xlu1 %v1339_v57 }
 0x7bf   : > { %v1338_v58 = vpop.xlane.xlu0 %1337 }
 0x7c0   : > { %2117 = vlog2.f32 %v1338_v58 }
 0x7c3   : > { %v1341_v59 = vpop.xlane.xlu1 %1340 }
 0x7c4   : > { %2119 = vlog2.f32 %v1341_v59 }
 0x7ca   : > { %v2118_v60 = vpop.eup %2117 }
 0x7cb   : > { %v1343_v61 = vmul.f32 0.6931472, %v2118_v60 }
 0x7cd   : > { %v1346_v62 = vadd.f32 %v1343_v61, %v1326_v48 }
 0x7ce   : > { %v2120_v63 = vpop.eup %2119 }
 0x7cf   : > { %v1348_v0 = vsub.f32 0.0, %v1346_v62  ;;  %v1345_v1 = vmul.f32 0.6931472, %v2120_v63 }
 0x7d1   : > { %v1350_v2 = vadd.f32 %v1348_v0, %v2500_v33  ;;  %v1347_v3 = vadd.f32 %v1345_v1, %v1329_v51 }
 0x7d3   : > { %v1352_v4 = vsel %vm1063_vm3, %v1350_v2, -inf  ;;  %v1349_v5 = vsub.f32 0.0, %v1347_v3 }
 0x7d4   : > { %v1353_v6 = vrot.slane %v1352_v4, 4 }
 0x7d5   : > { %v1351_v7 = vadd.f32 %v1349_v5, %v2507_v39 }
 0x7d6   : > { %v1354_v8 = vmax.f32 %v1352_v4, %v1353_v6 }
 0x7d7   : > { %v1359_v9 = vsel %vm1063_vm3, %v1351_v7, -inf }
 0x7d8   : > { %v1360_v10 = vrot.slane %v1359_v9, 4  ;;  %v1355_v11 = vrot.slane %v1354_v8, 2 }
 0x7da   : > { %v1361_v12 = vmax.f32 %v1359_v9, %v1360_v10  ;;  %v1356_v13 = vmax.f32 %v1354_v8, %v1355_v11 }
 0x7dc   : > { %v1357_v14 = vrot.slane %v1356_v13, 1  ;;  %v1362_v15 = vrot.slane %v1361_v12, 2 }
 0x7de   : > { %v1358_v16 = vmax.f32 %v1356_v13, %v1357_v14  ;;  %v1363_v17 = vmax.f32 %v1361_v12, %v1362_v15 }
 0x7e0   : > { %v1366_v18 = vsub.f32 %v1350_v2, %v1358_v16  ;;  %v1364_v19 = vrot.slane %v1363_v17, 1 }
 0x7e2   : > { %v1368_v20 = vmul.f32 1.442695, %v1366_v18  ;;  %v1365_v21 = vmax.f32 %v1363_v17, %v1364_v19 }
 0x7e4   : > { %2121 = vpow2.f32 %v1368_v20  ;;  %v1367_v22 = vsub.f32 %v1351_v7, %v1365_v21 }
 0x7e6   : > { %v1370_v23 = vmul.f32 1.442695, %v1367_v22 }
 0x7e8   : > { %2123 = vpow2.f32 %v1370_v23 }
 0x7ee   : > { %v2122_v24 = vpop.eup %2121 }
 0x7ef   : > { %v1372_v25 = vsel %vm1063_vm3, %v2122_v24, 0.0 }
 0x7f0   : > { %v1373_v28 = vrot.slane %v1372_v25, 4 }
 0x7f2   : > { %v2124_v29 = vpop.eup %2123  ;;  %v1374_v30 = vadd.f32 %v1373_v28, %v1372_v25 }
 0x7f3   : > { %v1379_v31 = vsel %vm1063_vm3, %v2124_v29, 0.0 }
 0x7f4   : > { %v1375_v32 = vrot.slane %v1374_v30, 2  ;;  %v1380_v34 = vrot.slane %v1379_v31, 4 }
 0x7f6   : > { %v1376_v35 = vadd.f32 %v1375_v32, %v1374_v30  ;;  %v1381_v36 = vadd.f32 %v1380_v34, %v1379_v31 }
 0x7f8   : > { %v1377_v37 = vrot.slane %v1376_v35, 1  ;;  %v1382_v38 = vrot.slane %v1381_v36, 2 }
 0x7fa   : > { %v1378_v40 = vadd.f32 %v1377_v37, %v1376_v35  ;;  %v1383_v41 = vadd.f32 %v1382_v38, %v1381_v36 }
 0x7fc   : > { %2125 = vlog2.f32 %v1378_v40  ;;  %v1384_v42 = vrot.slane %v1383_v41, 1 }
 0x7fe   : > { %v1385_v43 = vadd.f32 %v1384_v42, %v1383_v41 }
 0x800   : > { %2127 = vlog2.f32 %v1385_v43 }
 0x806   : > { %v2126_v44 = vpop.eup %2125 }
 0x807   : > { %v1387_v45 = vmul.f32 0.6931472, %v2126_v44 }
 0x809   : > { %v1390_v46 = vadd.f32 %v1387_v45, %v1358_v16 }
 0x80a   : > { %v2128_v47 = vpop.eup %2127 }
 0x80b   : > { %v1392_v48 = vsub.f32 0.0, %v1390_v46  ;;  %v1389_v49 = vmul.f32 0.6931472, %v2128_v47 }
 0x80d   : > { %v1394_v50 = vadd.f32 %v1392_v48, %v2500_v33  ;;  %v1391_v51 = vadd.f32 %v1389_v49, %v1365_v21 }
 0x80f   : > { %v1396_v52 = vsel %vm1063_vm3, %v1394_v50, -inf  ;;  %v1393_v53 = vsub.f32 0.0, %v1391_v51 }
 0x810   : > { %1397 = vmax.xlane.f32.xlu0 %v1396_v52 }
 0x811   : > { %v1395_v54 = vadd.f32 %v1393_v53, %v2507_v39 }
 0x813   : > { %v1399_v55 = vsel %vm1063_vm3, %v1395_v54, -inf }
 0x814   : > { %1400 = vmax.xlane.f32.xlu1 %v1399_v55 }
 0x89d   : > { %v1398_v56 = vpop.xlane.xlu0 %1397 }
 0x89e   : > { %v1402_v57 = vsub.f32 %v1394_v50, %v1398_v56 }
 0x8a0   : > { %v1404_v58 = vmul.f32 1.442695, %v1402_v57 }
 0x8a1   : > { %v1401_v59 = vpop.xlane.xlu1 %1400 }
 0x8a2   : > { %2129 = vpow2.f32 %v1404_v58  ;;  %v1403_v60 = vsub.f32 %v1395_v54, %v1401_v59 }
 0x8a4   : > { %v1406_v61 = vmul.f32 1.442695, %v1403_v60 }
 0x8a6   : > { %2131 = vpow2.f32 %v1406_v61 }
 0x8ac   : > { %v2130_v62 = vpop.eup %2129 }
 0x8ad   : > { %v1408_v63 = vsel %vm1063_vm3, %v2130_v62, 0.0 }
 0x8ae   : > { %1409 = vadd.xlane.f32.xlu0 %v1408_v63 }
 0x8b0   : > { %v2132_v0 = vpop.eup %2131 }
 0x8b1   : > { %v1411_v1 = vsel %vm1063_vm3, %v2132_v0, 0.0 }
 0x8b2   : > { %1412 = vadd.xlane.f32.xlu1 %v1411_v1 }
 0x93b   : > { %v1410_v2 = vpop.xlane.xlu0 %1409 }
 0x93c   : > { %2133 = vlog2.f32 %v1410_v2 }
 0x93f   : > { %v1413_v3 = vpop.xlane.xlu1 %1412 }
 0x940   : > { %2135 = vlog2.f32 %v1413_v3 }
 0x946   : > { %v2134_v4 = vpop.eup %2133 }
 0x947   : > { %v1415_v5 = vmul.f32 0.6931472, %v2134_v4 }
 0x949   : > { %v1418_v6 = vadd.f32 %v1415_v5, %v1398_v56 }
 0x94a   : > { %v2136_v7 = vpop.eup %2135 }
 0x94b   : > { %v1420_v8 = vsub.f32 0.0, %v1418_v6  ;;  %v1417_v9 = vmul.f32 0.6931472, %v2136_v7 }
 0x94d   : > { %v1422_v10 = vadd.f32 %v1420_v8, %v2500_v33  ;;  %v1419_v11 = vadd.f32 %v1417_v9, %v1401_v59 }
 0x94f   : > { %v1424_v12 = vsel %vm1063_vm3, %v1422_v10, -inf  ;;  %v1421_v13 = vsub.f32 0.0, %v1419_v11 }
 0x950   : > { %v1425_v14 = vrot.slane %v1424_v12, 4 }
 0x951   : > { %v1423_v15 = vadd.f32 %v1421_v13, %v2507_v39 }
 0x952   : > { %v1426_v16 = vmax.f32 %v1424_v12, %v1425_v14 }
 0x953   : > { %v1431_v17 = vsel %vm1063_vm3, %v1423_v15, -inf }
 0x954   : > { %v1432_v18 = vrot.slane %v1431_v17, 4  ;;  %v1427_v19 = vrot.slane %v1426_v16, 2 }
 0x956   : > { %v1433_v20 = vmax.f32 %v1431_v17, %v1432_v18  ;;  %v1428_v21 = vmax.f32 %v1426_v16, %v1427_v19 }
 0x958   : > { %v1429_v22 = vrot.slane %v1428_v21, 1  ;;  %v1434_v23 = vrot.slane %v1433_v20, 2 }
 0x95a   : > { %v1430_v24 = vmax.f32 %v1428_v21, %v1429_v22  ;;  %v1435_v25 = vmax.f32 %v1433_v20, %v1434_v23 }
 0x95c   : > { %v1438_v28 = vsub.f32 %v1422_v10, %v1430_v24  ;;  %v1436_v29 = vrot.slane %v1435_v25, 1 }
 0x95e   : > { %v1440_v30 = vmul.f32 1.442695, %v1438_v28  ;;  %v1437_v31 = vmax.f32 %v1435_v25, %v1436_v29 }
 0x960   : > { %2137 = vpow2.f32 %v1440_v30  ;;  %v1439_v32 = vsub.f32 %v1423_v15, %v1437_v31 }
 0x962   : > { %v1442_v34 = vmul.f32 1.442695, %v1439_v32 }
 0x964   : > { %2139 = vpow2.f32 %v1442_v34 }
 0x96a   : > { %v2138_v35 = vpop.eup %2137 }
 0x96b   : > { %v1444_v36 = vsel %vm1063_vm3, %v2138_v35, 0.0 }
 0x96c   : > { %v1445_v37 = vrot.slane %v1444_v36, 4 }
 0x96e   : > { %v2140_v38 = vpop.eup %2139  ;;  %v1446_v40 = vadd.f32 %v1445_v37, %v1444_v36 }
 0x96f   : > { %v1451_v41 = vsel %vm1063_vm3, %v2140_v38, 0.0 }
 0x970   : > { %v1447_v42 = vrot.slane %v1446_v40, 2  ;;  %v1452_v43 = vrot.slane %v1451_v41, 4 }
 0x972   : > { %v1448_v44 = vadd.f32 %v1447_v42, %v1446_v40  ;;  %v1453_v45 = vadd.f32 %v1452_v43, %v1451_v41 }
 0x974   : > { %v1449_v46 = vrot.slane %v1448_v44, 1  ;;  %v1454_v47 = vrot.slane %v1453_v45, 2 }
 0x976   : > { %v1450_v48 = vadd.f32 %v1449_v46, %v1448_v44  ;;  %v1455_v49 = vadd.f32 %v1454_v47, %v1453_v45 }
 0x978   : > { %2141 = vlog2.f32 %v1450_v48  ;;  %v1456_v50 = vrot.slane %v1455_v49, 1 }
 0x97a   : > { %v1457_v51 = vadd.f32 %v1456_v50, %v1455_v49 }
 0x97c   : > { %2143 = vlog2.f32 %v1457_v51 }
 0x982   : > { %v2142_v52 = vpop.eup %2141 }
 0x983   : > { %v1459_v53 = vmul.f32 0.6931472, %v2142_v52 }
 0x985   : > { %v1462_v54 = vadd.f32 %v1459_v53, %v1430_v24 }
 0x986   : > { %v2144_v55 = vpop.eup %2143 }
 0x987   : > { %v1464_v56 = vsub.f32 0.0, %v1462_v54  ;;  %v1461_v57 = vmul.f32 0.6931472, %v2144_v55 }
 0x989   : > { %v1466_v58 = vadd.f32 %v1464_v56, %v2500_v33  ;;  %v1463_v59 = vadd.f32 %v1461_v57, %v1437_v31 }
 0x98b   : > { %v1468_v60 = vsel %vm1063_vm3, %v1466_v58, -inf  ;;  %v1465_v61 = vsub.f32 0.0, %v1463_v59 }
 0x98c   : > { %1469 = vmax.xlane.f32.xlu0 %v1468_v60 }
 0x98d   : > { %v1467_v62 = vadd.f32 %v1465_v61, %v2507_v39 }
 0x98f   : > { %v1471_v63 = vsel %vm1063_vm3, %v1467_v62, -inf }
 0x990   : > { %1472 = vmax.xlane.f32.xlu1 %v1471_v63 }
 0xa19   : > { %v1470_v0 = vpop.xlane.xlu0 %1469 }
 0xa1a   : > { %v1474_v1 = vsub.f32 %v1466_v58, %v1470_v0 }
 0xa1c   : > { %v1476_v2 = vmul.f32 1.442695, %v1474_v1 }
 0xa1d   : > { %v1473_v3 = vpop.xlane.xlu1 %1472 }
 0xa1e   : > { %2145 = vpow2.f32 %v1476_v2  ;;  %v1475_v4 = vsub.f32 %v1467_v62, %v1473_v3 }
 0xa20   : > { %v1478_v5 = vmul.f32 1.442695, %v1475_v4 }
 0xa22   : > { %2147 = vpow2.f32 %v1478_v5 }
 0xa28   : > { %v2146_v6 = vpop.eup %2145 }
 0xa29   : > { %v1480_v7 = vsel %vm1063_vm3, %v2146_v6, 0.0 }
 0xa2a   : > { %1481 = vadd.xlane.f32.xlu0 %v1480_v7 }
 0xa2c   : > { %v2148_v8 = vpop.eup %2147 }
 0xa2d   : > { %v1483_v9 = vsel %vm1063_vm3, %v2148_v8, 0.0 }
 0xa2e   : > { %1484 = vadd.xlane.f32.xlu1 %v1483_v9 }
 0xab7   : > { %v1482_v10 = vpop.xlane.xlu0 %1481 }
 0xab8   : > { %2149 = vlog2.f32 %v1482_v10 }
 0xabb   : > { %v1485_v11 = vpop.xlane.xlu1 %1484 }
 0xabc   : > { %2151 = vlog2.f32 %v1485_v11 }
 0xac2   : > { %v2150_v12 = vpop.eup %2149 }
 0xac3   : > { %v1487_v13 = vmul.f32 0.6931472, %v2150_v12 }
 0xac5   : > { %v1490_v14 = vadd.f32 %v1487_v13, %v1470_v0 }
 0xac6   : > { %v2152_v15 = vpop.eup %2151 }
 0xac7   : > { %v1492_v16 = vsub.f32 0.0, %v1490_v14  ;;  %v1489_v17 = vmul.f32 0.6931472, %v2152_v15 }
 0xac9   : > { %v1494_v18 = vadd.f32 %v1492_v16, %v2500_v33  ;;  %v1491_v19 = vadd.f32 %v1489_v17, %v1473_v3 }
 0xacb   : > { %v1496_v20 = vsel %vm1063_vm3, %v1494_v18, -inf  ;;  %v1493_v21 = vsub.f32 0.0, %v1491_v19 }
 0xacc   : > { %v1497_v22 = vrot.slane %v1496_v20, 4 }
 0xacd   : > { %v1495_v23 = vadd.f32 %v1493_v21, %v2507_v39 }
 0xace   : > { %v1498_v24 = vmax.f32 %v1496_v20, %v1497_v22 }
 0xacf   : > { %v1503_v25 = vsel %vm1063_vm3, %v1495_v23, -inf }
 0xad0   : > { %v1504_v28 = vrot.slane %v1503_v25, 4  ;;  %v1499_v29 = vrot.slane %v1498_v24, 2 }
 0xad2   : > { %v1505_v30 = vmax.f32 %v1503_v25, %v1504_v28  ;;  %v1500_v31 = vmax.f32 %v1498_v24, %v1499_v29 }
 0xad4   : > { %v1501_v32 = vrot.slane %v1500_v31, 1  ;;  %v1506_v34 = vrot.slane %v1505_v30, 2 }
 0xad6   : > { %v1502_v35 = vmax.f32 %v1500_v31, %v1501_v32  ;;  %v1507_v36 = vmax.f32 %v1505_v30, %v1506_v34 }
 0xad8   : > { %v1510_v37 = vsub.f32 %v1494_v18, %v1502_v35  ;;  %v1508_v38 = vrot.slane %v1507_v36, 1 }
 0xada   : > { %v1512_v40 = vmul.f32 1.442695, %v1510_v37  ;;  %v1509_v41 = vmax.f32 %v1507_v36, %v1508_v38 }
 0xadc   : > { %2153 = vpow2.f32 %v1512_v40  ;;  %v1511_v42 = vsub.f32 %v1495_v23, %v1509_v41 }
 0xade   : > { %v1514_v43 = vmul.f32 1.442695, %v1511_v42 }
 0xae0   : > { %2155 = vpow2.f32 %v1514_v43 }
 0xae6   : > { %v2154_v44 = vpop.eup %2153 }
 0xae7   : > { %v1516_v45 = vsel %vm1063_vm3, %v2154_v44, 0.0 }
 0xae8   : > { %v1517_v46 = vrot.slane %v1516_v45, 4 }
 0xaea   : > { %v2156_v47 = vpop.eup %2155  ;;  %v1518_v48 = vadd.f32 %v1517_v46, %v1516_v45 }
 0xaeb   : > { %v1523_v49 = vsel %vm1063_vm3, %v2156_v47, 0.0 }
 0xaec   : > { %v1519_v50 = vrot.slane %v1518_v48, 2  ;;  %v1524_v51 = vrot.slane %v1523_v49, 4 }
 0xaee   : > { %v1520_v52 = vadd.f32 %v1519_v50, %v1518_v48  ;;  %v1525_v53 = vadd.f32 %v1524_v51, %v1523_v49 }
 0xaf0   : > { %v1521_v54 = vrot.slane %v1520_v52, 1  ;;  %v1526_v55 = vrot.slane %v1525_v53, 2 }
 0xaf2   : > { %v1522_v56 = vadd.f32 %v1521_v54, %v1520_v52  ;;  %v1527_v57 = vadd.f32 %v1526_v55, %v1525_v53 }
 0xaf4   : > { %2157 = vlog2.f32 %v1522_v56  ;;  %v1528_v58 = vrot.slane %v1527_v57, 1 }
 0xaf6   : > { %v1529_v59 = vadd.f32 %v1528_v58, %v1527_v57 }
 0xaf8   : > { %2159 = vlog2.f32 %v1529_v59 }
 0xafe   : > { %v2158_v60 = vpop.eup %2157 }
 0xaff   : > { %v1531_v61 = vmul.f32 0.6931472, %v2158_v60 }
 0xb01   : > { %v1534_v62 = vadd.f32 %v1531_v61, %v1502_v35 }
 0xb02   : > { %v2160_v63 = vpop.eup %2159 }
 0xb03   : > { %v1536_v0 = vsub.f32 0.0, %v1534_v62  ;;  %v1533_v1 = vmul.f32 0.6931472, %v2160_v63 }
 0xb05   : > { %v1538_v2 = vadd.f32 %v1536_v0, %v2500_v33  ;;  %v1535_v3 = vadd.f32 %v1533_v1, %v1509_v41 }
 0xb07   : > { %v1540_v4 = vsel %vm1063_vm3, %v1538_v2, -inf  ;;  %v1537_v5 = vsub.f32 0.0, %v1535_v3 }
 0xb08   : > { %1541 = vmax.xlane.f32.xlu0 %v1540_v4 }
 0xb09   : > { %v1539_v6 = vadd.f32 %v1537_v5, %v2507_v39 }
 0xb0b   : > { %v1543_v7 = vsel %vm1063_vm3, %v1539_v6, -inf }
 0xb0c   : > { %1544 = vmax.xlane.f32.xlu1 %v1543_v7 }
 0xb95   : > { %v1542_v8 = vpop.xlane.xlu0 %1541 }
 0xb96   : > { %v1546_v9 = vsub.f32 %v1538_v2, %v1542_v8 }
 0xb98   : > { %v1548_v10 = vmul.f32 1.442695, %v1546_v9 }
 0xb99   : > { %v1545_v11 = vpop.xlane.xlu1 %1544 }
 0xb9a   : > { %2161 = vpow2.f32 %v1548_v10  ;;  %v1547_v12 = vsub.f32 %v1539_v6, %v1545_v11 }
 0xb9c   : > { %v1550_v13 = vmul.f32 1.442695, %v1547_v12 }
 0xb9e   : > { %2163 = vpow2.f32 %v1550_v13 }
 0xba4   : > { %v2162_v14 = vpop.eup %2161 }
 0xba5   : > { %v1552_v15 = vsel %vm1063_vm3, %v2162_v14, 0.0 }
 0xba6   : > { %1553 = vadd.xlane.f32.xlu0 %v1552_v15 }
 0xba8   : > { %v2164_v16 = vpop.eup %2163 }
 0xba9   : > { %v1555_v17 = vsel %vm1063_vm3, %v2164_v16, 0.0 }
 0xbaa   : > { %1556 = vadd.xlane.f32.xlu1 %v1555_v17 }
 0xc33   : > { %v1554_v18 = vpop.xlane.xlu0 %1553 }
 0xc34   : > { %2165 = vlog2.f32 %v1554_v18 }
 0xc37   : > { %v1557_v19 = vpop.xlane.xlu1 %1556 }
 0xc38   : > { %2167 = vlog2.f32 %v1557_v19 }
 0xc3e   : > { %v2166_v20 = vpop.eup %2165 }
 0xc3f   : > { %v1559_v21 = vmul.f32 0.6931472, %v2166_v20 }
 0xc41   : > { %v1562_v22 = vadd.f32 %v1559_v21, %v1542_v8 }
 0xc42   : > { %v2168_v23 = vpop.eup %2167 }
 0xc43   : > { %v1564_v24 = vsub.f32 0.0, %v1562_v22  ;;  %v1561_v25 = vmul.f32 0.6931472, %v2168_v23 }
 0xc45   : > { %v1566_v28 = vadd.f32 %v1564_v24, %v2500_v33  ;;  %v1563_v29 = vadd.f32 %v1561_v25, %v1545_v11 }
 0xc47   : > { %v1568_v30 = vsel %vm1063_vm3, %v1566_v28, -inf  ;;  %v1565_v31 = vsub.f32 0.0, %v1563_v29 }
 0xc48   : > { %v1569_v32 = vrot.slane %v1568_v30, 4 }
 0xc49   : > { %v1567_v34 = vadd.f32 %v1565_v31, %v2507_v39 }
 0xc4a   : > { %v1570_v35 = vmax.f32 %v1568_v30, %v1569_v32 }
 0xc4b   : > { %v1575_v36 = vsel %vm1063_vm3, %v1567_v34, -inf }
 0xc4c   : > { %v1576_v37 = vrot.slane %v1575_v36, 4  ;;  %v1571_v38 = vrot.slane %v1570_v35, 2 }
 0xc4e   : > { %v1577_v40 = vmax.f32 %v1575_v36, %v1576_v37  ;;  %v1572_v41 = vmax.f32 %v1570_v35, %v1571_v38 }
 0xc50   : > { %v1573_v42 = vrot.slane %v1572_v41, 1  ;;  %v1578_v43 = vrot.slane %v1577_v40, 2 }
 0xc52   : > { %v1574_v44 = vmax.f32 %v1572_v41, %v1573_v42  ;;  %v1579_v45 = vmax.f32 %v1577_v40, %v1578_v43 }
 0xc54   : > { %v1582_v46 = vsub.f32 %v1566_v28, %v1574_v44  ;;  %v1580_v47 = vrot.slane %v1579_v45, 1 }
 0xc56   : > { %v1584_v48 = vmul.f32 1.442695, %v1582_v46  ;;  %v1581_v49 = vmax.f32 %v1579_v45, %v1580_v47 }
 0xc58   : > { %2169 = vpow2.f32 %v1584_v48  ;;  %v1583_v50 = vsub.f32 %v1567_v34, %v1581_v49 }
 0xc5a   : > { %v1586_v51 = vmul.f32 1.442695, %v1583_v50 }
 0xc5c   : > { %2171 = vpow2.f32 %v1586_v51 }
 0xc62   : > { %v2170_v52 = vpop.eup %2169 }
 0xc63   : > { %v1588_v53 = vsel %vm1063_vm3, %v2170_v52, 0.0 }
 0xc64   : > { %v1589_v54 = vrot.slane %v1588_v53, 4 }
 0xc66   : > { %v2172_v55 = vpop.eup %2171  ;;  %v1590_v56 = vadd.f32 %v1589_v54, %v1588_v53 }
 0xc67   : > { %v1595_v57 = vsel %vm1063_vm3, %v2172_v55, 0.0 }
 0xc68   : > { %v1591_v58 = vrot.slane %v1590_v56, 2  ;;  %v1596_v59 = vrot.slane %v1595_v57, 4 }
 0xc6a   : > { %v1592_v60 = vadd.f32 %v1591_v58, %v1590_v56  ;;  %v1597_v61 = vadd.f32 %v1596_v59, %v1595_v57 }
 0xc6c   : > { %v1593_v62 = vrot.slane %v1592_v60, 1  ;;  %v1598_v63 = vrot.slane %v1597_v61, 2 }
 0xc6e   : > { %v1594_v0 = vadd.f32 %v1593_v62, %v1592_v60  ;;  %v1599_v1 = vadd.f32 %v1598_v63, %v1597_v61 }
 0xc70   : > { %2173 = vlog2.f32 %v1594_v0  ;;  %v1600_v2 = vrot.slane %v1599_v1, 1 }
 0xc72   : > { %v1601_v3 = vadd.f32 %v1600_v2, %v1599_v1 }
 0xc74   : > { %2175 = vlog2.f32 %v1601_v3 }
 0xc7a   : > { %v2174_v4 = vpop.eup %2173 }
 0xc7b   : > { %v1603_v5 = vmul.f32 0.6931472, %v2174_v4 }
 0xc7d   : > { %v1606_v6 = vadd.f32 %v1603_v5, %v1574_v44 }
 0xc7e   : > { %v2176_v7 = vpop.eup %2175 }
 0xc7f   : > { %v1608_v8 = vsub.f32 0.0, %v1606_v6  ;;  %v1605_v9 = vmul.f32 0.6931472, %v2176_v7 }
 0xc81   : > { %v1610_v10 = vadd.f32 %v1608_v8, %v2500_v33  ;;  %v1607_v11 = vadd.f32 %v1605_v9, %v1581_v49 }
 0xc83   : > { %v1612_v12 = vsel %vm1063_vm3, %v1610_v10, -inf  ;;  %v1609_v13 = vsub.f32 0.0, %v1607_v11 }
 0xc84   : > { %1613 = vmax.xlane.f32.xlu0 %v1612_v12 }
 0xc85   : > { %v1611_v14 = vadd.f32 %v1609_v13, %v2507_v39 }
 0xc87   : > { %v1615_v15 = vsel %vm1063_vm3, %v1611_v14, -inf }
 0xc88   : > { %1616 = vmax.xlane.f32.xlu1 %v1615_v15 }
 0xd11   : > { %v1614_v16 = vpop.xlane.xlu0 %1613 }
 0xd12   : > { %v1618_v17 = vsub.f32 %v1610_v10, %v1614_v16 }
 0xd14   : > { %v1620_v18 = vmul.f32 1.442695, %v1618_v17 }
 0xd15   : > { %v1617_v19 = vpop.xlane.xlu1 %1616 }
 0xd16   : > { %2177 = vpow2.f32 %v1620_v18  ;;  %v1619_v20 = vsub.f32 %v1611_v14, %v1617_v19 }
 0xd18   : > { %v1622_v21 = vmul.f32 1.442695, %v1619_v20 }
 0xd1a   : > { %2179 = vpow2.f32 %v1622_v21 }
 0xd20   : > { %v2178_v22 = vpop.eup %2177 }
 0xd21   : > { %v1624_v23 = vsel %vm1063_vm3, %v2178_v22, 0.0 }
 0xd22   : > { %1625 = vadd.xlane.f32.xlu0 %v1624_v23 }
 0xd24   : > { %v2180_v24 = vpop.eup %2179 }
 0xd25   : > { %v1627_v25 = vsel %vm1063_vm3, %v2180_v24, 0.0 }
 0xd26   : > { %1628 = vadd.xlane.f32.xlu1 %v1627_v25 }
 0xdaf   : > { %v1626_v28 = vpop.xlane.xlu0 %1625 }
 0xdb0   : > { %2181 = vlog2.f32 %v1626_v28 }
 0xdb3   : > { %v1629_v29 = vpop.xlane.xlu1 %1628 }
 0xdb4   : > { %2183 = vlog2.f32 %v1629_v29 }
 0xdba   : > { %v2182_v30 = vpop.eup %2181 }
 0xdbb   : > { %v1631_v31 = vmul.f32 0.6931472, %v2182_v30 }
 0xdbd   : > { %v1634_v32 = vadd.f32 %v1631_v31, %v1614_v16 }
 0xdbe   : > { %v2184_v34 = vpop.eup %2183 }
 0xdbf   : > { %v1636_v35 = vsub.f32 0.0, %v1634_v32  ;;  %v1633_v36 = vmul.f32 0.6931472, %v2184_v34 }
 0xdc1   : > { %v1638_v37 = vadd.f32 %v1636_v35, %v2500_v33  ;;  %v1635_v38 = vadd.f32 %v1633_v36, %v1617_v19 }
 0xdc3   : > { %v1640_v40 = vsel %vm1063_vm3, %v1638_v37, -inf  ;;  %v1637_v41 = vsub.f32 0.0, %v1635_v38 }
 0xdc4   : > { %v1641_v42 = vrot.slane %v1640_v40, 4 }
 0xdc5   : > { %v1639_v43 = vadd.f32 %v1637_v41, %v2507_v39 }
 0xdc6   : > { %v1642_v44 = vmax.f32 %v1640_v40, %v1641_v42 }
 0xdc7   : > { %v1647_v45 = vsel %vm1063_vm3, %v1639_v43, -inf }
 0xdc8   : > { %v1648_v46 = vrot.slane %v1647_v45, 4  ;;  %v1643_v47 = vrot.slane %v1642_v44, 2 }
 0xdca   : > { %v1649_v48 = vmax.f32 %v1647_v45, %v1648_v46  ;;  %v1644_v49 = vmax.f32 %v1642_v44, %v1643_v47 }
 0xdcc   : > { %v1645_v50 = vrot.slane %v1644_v49, 1  ;;  %v1650_v51 = vrot.slane %v1649_v48, 2 }
 0xdce   : > { %v1646_v52 = vmax.f32 %v1644_v49, %v1645_v50  ;;  %v1651_v53 = vmax.f32 %v1649_v48, %v1650_v51 }
 0xdd0   : > { %v1654_v54 = vsub.f32 %v1638_v37, %v1646_v52  ;;  %v1652_v55 = vrot.slane %v1651_v53, 1 }
 0xdd2   : > { %v1656_v56 = vmul.f32 1.442695, %v1654_v54  ;;  %v1653_v57 = vmax.f32 %v1651_v53, %v1652_v55 }
 0xdd4   : > { %2185 = vpow2.f32 %v1656_v56  ;;  %v1655_v58 = vsub.f32 %v1639_v43, %v1653_v57 }
 0xdd6   : > { %v1658_v59 = vmul.f32 1.442695, %v1655_v58 }
 0xdd8   : > { %2187 = vpow2.f32 %v1658_v59 }
 0xdde   : > { %v2186_v60 = vpop.eup %2185 }
 0xddf   : > { %v1660_v61 = vsel %vm1063_vm3, %v2186_v60, 0.0 }
 0xde0   : > { %v1661_v62 = vrot.slane %v1660_v61, 4 }
 0xde2   : > { %v2188_v63 = vpop.eup %2187  ;;  %v1662_v0 = vadd.f32 %v1661_v62, %v1660_v61 }
 0xde3   : > { %v1667_v1 = vsel %vm1063_vm3, %v2188_v63, 0.0 }
 0xde4   : > { %v1663_v2 = vrot.slane %v1662_v0, 2  ;;  %v1668_v3 = vrot.slane %v1667_v1, 4 }
 0xde6   : > { %v1664_v4 = vadd.f32 %v1663_v2, %v1662_v0  ;;  %v1669_v5 = vadd.f32 %v1668_v3, %v1667_v1 }
 0xde8   : > { %v1665_v6 = vrot.slane %v1664_v4, 1  ;;  %v1670_v7 = vrot.slane %v1669_v5, 2 }
 0xdea   : > { %v1666_v8 = vadd.f32 %v1665_v6, %v1664_v4  ;;  %v1671_v9 = vadd.f32 %v1670_v7, %v1669_v5 }
 0xdec   : > { %2189 = vlog2.f32 %v1666_v8  ;;  %v1672_v10 = vrot.slane %v1671_v9, 1 }
 0xdee   : > { %v1673_v11 = vadd.f32 %v1672_v10, %v1671_v9 }
 0xdf0   : > { %2191 = vlog2.f32 %v1673_v11 }
 0xdf6   : > { %v2190_v12 = vpop.eup %2189 }
 0xdf7   : > { %v1675_v13 = vmul.f32 0.6931472, %v2190_v12 }
 0xdf9   : > { %v1678_v14 = vadd.f32 %v1675_v13, %v1646_v52 }
 0xdfa   : > { %v2192_v15 = vpop.eup %2191 }
 0xdfb   : > { %v1680_v16 = vsub.f32 0.0, %v1678_v14  ;;  %v1677_v17 = vmul.f32 0.6931472, %v2192_v15 }
 0xdfd   : > { %v1682_v18 = vadd.f32 %v1680_v16, %v2500_v33  ;;  %v1679_v19 = vadd.f32 %v1677_v17, %v1653_v57 }
 0xdff   : > { %v1684_v20 = vsel %vm1063_vm3, %v1682_v18, -inf  ;;  %v1681_v21 = vsub.f32 0.0, %v1679_v19 }
 0xe00   : > { %1685 = vmax.xlane.f32.xlu0 %v1684_v20 }
 0xe01   : > { %v1683_v22 = vadd.f32 %v1681_v21, %v2507_v39 }
 0xe03   : > { %v1687_v23 = vsel %vm1063_vm3, %v1683_v22, -inf }
 0xe04   : > { %1688 = vmax.xlane.f32.xlu1 %v1687_v23 }
 0xe8d   : > { %v1686_v24 = vpop.xlane.xlu0 %1685 }
 0xe8e   : > { %v1690_v25 = vsub.f32 %v1682_v18, %v1686_v24 }
 0xe90   : > { %v1692_v28 = vmul.f32 1.442695, %v1690_v25 }
 0xe91   : > { %v1689_v29 = vpop.xlane.xlu1 %1688 }
 0xe92   : > { %2193 = vpow2.f32 %v1692_v28  ;;  %v1691_v30 = vsub.f32 %v1683_v22, %v1689_v29 }
 0xe94   : > { %v1694_v31 = vmul.f32 1.442695, %v1691_v30 }
 0xe96   : > { %2195 = vpow2.f32 %v1694_v31 }
 0xe9c   : > { %v2194_v32 = vpop.eup %2193 }
 0xe9d   : > { %v1696_v34 = vsel %vm1063_vm3, %v2194_v32, 0.0 }
 0xe9e   : > { %1697 = vadd.xlane.f32.xlu0 %v1696_v34 }
 0xea0   : > { %v2196_v35 = vpop.eup %2195 }
 0xea1   : > { %v1699_v36 = vsel %vm1063_vm3, %v2196_v35, 0.0 }
 0xea2   : > { %1700 = vadd.xlane.f32.xlu1 %v1699_v36 }
 0xf2b   : > { %v1698_v37 = vpop.xlane.xlu0 %1697 }
 0xf2c   : > { %2197 = vlog2.f32 %v1698_v37 }
 0xf2f   : > { %v1701_v38 = vpop.xlane.xlu1 %1700 }
 0xf30   : > { %2199 = vlog2.f32 %v1701_v38 }
 0xf36   : > { %v2198_v40 = vpop.eup %2197 }
 0xf37   : > { %v1703_v41 = vmul.f32 0.6931472, %v2198_v40 }
 0xf39   : > { %v1706_v42 = vadd.f32 %v1703_v41, %v1686_v24 }
 0xf3a   : > { %v2200_v43 = vpop.eup %2199 }
 0xf3b   : > { %v1708_v44 = vsub.f32 0.0, %v1706_v42  ;;  %v1705_v45 = vmul.f32 0.6931472, %v2200_v43 }
 0xf3d   : > { %v1710_v46 = vadd.f32 %v1708_v44, %v2500_v33  ;;  %v1707_v47 = vadd.f32 %v1705_v45, %v1689_v29 }
 0xf3f   : > { %v1712_v48 = vsel %vm1063_vm3, %v1710_v46, -inf  ;;  %v1709_v49 = vsub.f32 0.0, %v1707_v47 }
 0xf40   : > { %v1713_v50 = vrot.slane %v1712_v48, 4 }
 0xf41   : > { %v1711_v51 = vadd.f32 %v1709_v49, %v2507_v39 }
 0xf42   : > { %v1714_v52 = vmax.f32 %v1712_v48, %v1713_v50 }
 0xf43   : > { %v1719_v53 = vsel %vm1063_vm3, %v1711_v51, -inf }
 0xf44   : > { %v1720_v54 = vrot.slane %v1719_v53, 4  ;;  %v1715_v55 = vrot.slane %v1714_v52, 2 }
 0xf46   : > { %v1721_v56 = vmax.f32 %v1719_v53, %v1720_v54  ;;  %v1716_v57 = vmax.f32 %v1714_v52, %v1715_v55 }
 0xf48   : > { %v1717_v58 = vrot.slane %v1716_v57, 1  ;;  %v1722_v59 = vrot.slane %v1721_v56, 2 }
 0xf4a   : > { %v1718_v60 = vmax.f32 %v1716_v57, %v1717_v58  ;;  %v1723_v61 = vmax.f32 %v1721_v56, %v1722_v59 }
 0xf4c   : > { %v1726_v62 = vsub.f32 %v1710_v46, %v1718_v60  ;;  %v1724_v63 = vrot.slane %v1723_v61, 1 }
 0xf4e   : > { %v1728_v0 = vmul.f32 1.442695, %v1726_v62  ;;  %v1725_v1 = vmax.f32 %v1723_v61, %v1724_v63 }
 0xf50   : > { %2201 = vpow2.f32 %v1728_v0  ;;  %v1727_v2 = vsub.f32 %v1711_v51, %v1725_v1 }
 0xf52   : > { %v1730_v3 = vmul.f32 1.442695, %v1727_v2 }
 0xf54   : > { %2203 = vpow2.f32 %v1730_v3 }
 0xf5a   : > { %v2202_v4 = vpop.eup %2201 }
 0xf5b   : > { %v1732_v5 = vsel %vm1063_vm3, %v2202_v4, 0.0 }
 0xf5c   : > { %v1733_v6 = vrot.slane %v1732_v5, 4 }
 0xf5e   : > { %v2204_v7 = vpop.eup %2203  ;;  %v1734_v8 = vadd.f32 %v1733_v6, %v1732_v5 }
 0xf5f   : > { %v1739_v9 = vsel %vm1063_vm3, %v2204_v7, 0.0 }
 0xf60   : > { %v1735_v10 = vrot.slane %v1734_v8, 2  ;;  %v1740_v11 = vrot.slane %v1739_v9, 4 }
 0xf62   : > { %v1736_v12 = vadd.f32 %v1735_v10, %v1734_v8  ;;  %v1741_v13 = vadd.f32 %v1740_v11, %v1739_v9 }
 0xf64   : > { %v1737_v14 = vrot.slane %v1736_v12, 1  ;;  %v1742_v15 = vrot.slane %v1741_v13, 2 }
 0xf66   : > { %v1738_v16 = vadd.f32 %v1737_v14, %v1736_v12  ;;  %v1743_v17 = vadd.f32 %v1742_v15, %v1741_v13 }
 0xf68   : > { %2205 = vlog2.f32 %v1738_v16  ;;  %v1744_v18 = vrot.slane %v1743_v17, 1 }
 0xf6a   : > { %v1745_v19 = vadd.f32 %v1744_v18, %v1743_v17 }
 0xf6c   : > { %2207 = vlog2.f32 %v1745_v19 }
 0xf72   : > { %v2206_v20 = vpop.eup %2205 }
 0xf73   : > { %v1747_v21 = vmul.f32 0.6931472, %v2206_v20 }
 0xf75   : > { %v1750_v22 = vadd.f32 %v1747_v21, %v1718_v60 }
 0xf76   : > { %v2208_v23 = vpop.eup %2207 }
 0xf77   : > { %v1752_v24 = vsub.f32 0.0, %v1750_v22  ;;  %v1749_v25 = vmul.f32 0.6931472, %v2208_v23 }
 0xf79   : > { %v1754_v28 = vadd.f32 %v1752_v24, %v2500_v33  ;;  %v1751_v29 = vadd.f32 %v1749_v25, %v1725_v1 }
 0xf7b   : > { %v1756_v30 = vsel %vm1063_vm3, %v1754_v28, -inf  ;;  %v1753_v31 = vsub.f32 0.0, %v1751_v29 }
 0xf7c   : > { %1757 = vmax.xlane.f32.xlu0 %v1756_v30 }
 0xf7d   : > { %v1755_v32 = vadd.f32 %v1753_v31, %v2507_v39 }
 0xf7f   : > { %v1759_v34 = vsel %vm1063_vm3, %v1755_v32, -inf }
 0xf80   : > { %1760 = vmax.xlane.f32.xlu1 %v1759_v34 }
0x1009   : > { %v1758_v35 = vpop.xlane.xlu0 %1757 }
0x100a   : > { %v1762_v36 = vsub.f32 %v1754_v28, %v1758_v35 }
0x100c   : > { %v1764_v37 = vmul.f32 1.442695, %v1762_v36 }
0x100d   : > { %v1761_v38 = vpop.xlane.xlu1 %1760 }
0x100e   : > { %2209 = vpow2.f32 %v1764_v37  ;;  %v1763_v40 = vsub.f32 %v1755_v32, %v1761_v38 }
0x1010   : > { %v1766_v41 = vmul.f32 1.442695, %v1763_v40 }
0x1012   : > { %2211 = vpow2.f32 %v1766_v41 }
0x1018   : > { %v2210_v42 = vpop.eup %2209 }
0x1019   : > { %v1768_v43 = vsel %vm1063_vm3, %v2210_v42, 0.0 }
0x101a   : > { %1769 = vadd.xlane.f32.xlu0 %v1768_v43 }
0x101c   : > { %v2212_v44 = vpop.eup %2211 }
0x101d   : > { %v1771_v45 = vsel %vm1063_vm3, %v2212_v44, 0.0 }
0x101e   : > { %1772 = vadd.xlane.f32.xlu1 %v1771_v45 }
0x10a7   : > { %v1770_v46 = vpop.xlane.xlu0 %1769 }
0x10a8   : > { %2213 = vlog2.f32 %v1770_v46 }
0x10ab   : > { %v1773_v47 = vpop.xlane.xlu1 %1772 }
0x10ac   : > { %2215 = vlog2.f32 %v1773_v47 }
0x10b2   : > { %v2214_v48 = vpop.eup %2213 }
0x10b3   : > { %v1775_v49 = vmul.f32 0.6931472, %v2214_v48 }
0x10b5   : > { %v1778_v50 = vadd.f32 %v1775_v49, %v1758_v35 }
0x10b6   : > { %v2216_v51 = vpop.eup %2215 }
0x10b7   : > { %v1780_v52 = vsub.f32 0.0, %v1778_v50  ;;  %v1777_v53 = vmul.f32 0.6931472, %v2216_v51 }
0x10b9   : > { %v1782_v54 = vadd.f32 %v1780_v52, %v2500_v33  ;;  %v1779_v55 = vadd.f32 %v1777_v53, %v1761_v38 }
0x10bb   : > { %v1784_v56 = vadd.f32 %v1782_v54, %v1752_v24  ;;  %v1781_v57 = vsub.f32 0.0, %v1779_v55 }
0x10bd   : > { %v1786_v58 = vsel %vm1054_vm2, 0.0, %v1784_v56  ;;  %v1783_v59 = vadd.f32 %v1781_v57, %v2507_v39 }
0x10be   : > { %v1788_v60 = vmul.f32 1.442695, %v1786_v58 }
0x10bf   : > { %v1785_v61 = vadd.f32 %v1783_v59, %v1753_v31 }
0x10c0   : > { %2217 = vpow2.f32 %v1788_v60 }
0x10c1   : > { %v1787_v62 = vsel %vm1054_vm2, 0.0, %v1785_v61 }
0x10c2   : > { %v1790_v63 = vmul.f32 1.442695, %v1787_v62 }
0x10c4   : > { %2219 = vpow2.f32 %v1790_v63 }
0x10ca   : > { %v2218_v33 = vpop.eup %2217 }
0x10cb   : > { %1792 = vst.msk [vmem:[%s134_s25] sm:$0xff] %vm1063_vm3, %v2218_v33 }
0x10ce   : > { %v2220_v26 = vpop.eup %2219 }
0x10cf   : > { %1793 = vst.msk [vmem:[%s134_s25 + $0x8] sm:$0xff] %vm1063_vm3, %v2220_v26 }
0x10d0   : > { %2264 = shalt.err (!%p2261_p2)
}
0x10d1   : > { %s2265_s13 = scalar_lea.hbm %s2644_s2, 256  ;;  %s2269_s20 = scalar_lea.hbm %s2692_s1, 512 }
0x10d2   : > { %p2266_p4 = scmp.ne.s32.totalorder %s2644_s2, %s2265_s13  ;;  %p2270_p9 = scmp.lt.u32.totalorder %s2644_s2, %s2692_s1 }
0x10d3   : > { %p2271_p1 = scmp.lt.u32.totalorder %s2269_s20, %s2265_s13  ;;  %p2273_p6 = scmp.lt.u32.totalorder %s2265_s13, %s2644_s2 }
0x10d4   : > { %p2267_p5 = pnand %p2266_p4, %p2699_p11 }
0x10d5   : > { %p2272_p3 = por %p2271_p1, %p2270_p9 }
0x10d6   : > { %p2268_p7 = pneg %p2267_p5 }
0x10d7   : > { %p2274_p12 = por %p2273_p6, %p2272_p3 }
0x10d9   : > { %p2275_p13 = pnand %p2274_p12, %p2268_p7 }
0x10db   : > { %2278 = shalt.err (!%p2275_p13)
}
0x10dc   : > { %s2325_s24 = smov 128   ;;  %s2326_s26 = smov 8  }
0x10dd   : > { %2003 = dma.vmem_to_hbm [thread:$0]  (%p2699_p11), %s2646_s27, 256, %s2644_s2, %s1795_s10, %s2325_s24, %s2325_s24, %s2326_s26  }
0x10de PF: > { %s1823_s30 = sand.u32 1, %s2305_s6   ;;  %p2700_p8 = scmp.ne.s32.totalorder %s2697_s19, 0 }
0x10df   : > { %p2701_p10 = scmp.ge.s32.totalorder %s2317_s9, 2  ;;  %s1824_s17 = scalar_lea.sflag [#allocation4], %s1823_s30 }
0x10e1   : > { %p2010_p0 = pnand %p2701_p10, %p2700_p8 }
0x10e3   : > { %2300 = dma.done.wait (!%p2010_p0), %s1824_s17, 256  }
0x10e4   : > { %2302 = vsyncadd (!%p2010_p0), %s1824_s17, 4294967040  ;;  %p14_p2 = scmp.ge.s32.totalorder %s2362_s12, 4   ;;  %s2702_s6 = smov %s2309_s7 }
0x10e5   : > { %s2703_s7 = smov %s2313_s8  ;;  %s2704_s8 = smov %s2374_s15 }
0x10e6   : > { %s2705_s9 = smov %s2362_s12  ;;  %16 = sbr.rel (!%p14_p2) target bundleno = 5 (0x5), region = 69 }
0x10ed   :  { %1829 = vsyncpa [#allocation3], 1 }
0x10ee   :  { %1831 = vsyncpa [#allocation3 + $0x1], 1 }
0x10ef   :  { %1832 = vsyncpa [#allocation4], 1 }
0x10f0   :  { %1834 = vsyncpa [#allocation4 + $0x1], 1 }

</bundles_post_ra>
